<compile_context>
chip_gen: v6e
topology: v6e:2x2x1
jax: 0.10.0
libtpu: 0.0.40
codegen_flags: <defaults>
</compile_context>

<pallas_src>
import jax
import jax.numpy as jnp
from jax.experimental import pallas as pl
from jax.experimental.pallas import tpu as pltpu


def _lstm_policy_seq_kernel(xe_ref, hx0_ref, cx0_ref,
                            wxe_ref, whh_ref, bg_ref, whead_ref, bh_ref,
                            head_ref, h_ref, c_ref,
                            xw_ref, hbuf_ref):
    """Whole T-step rollout for one batch block; grid = (n_batch_blocks,)."""
    T, blk, D = xe_ref.shape
    H = whh_ref.shape[0]
    n_head = whead_ref.shape[1]

    # ---- Precompute the input projection for ALL timesteps with one big
    #      (T*blk, D) x (D, 4H) MXU matmul; fold in the gate bias. ----
    xe2 = xe_ref[...].reshape(T * blk, D).astype(jnp.bfloat16)
    xw2 = jnp.dot(xe2, wxe_ref[...], preferred_element_type=jnp.float32)
    xw_ref[...] = (xw2 + bg_ref[...]).reshape(T, blk, 4 * H)

    # Per-column constants implementing sigmoid(x) = 0.5*tanh(0.5*x) + 0.5 for
    # the i/f/o gates and plain tanh for the g gate, so the whole 4H-lane gates
    # tile needs a single EUP tanh per step.
    col = jax.lax.broadcasted_iota(jnp.int32, (1, 4 * H), 1)
    is_g = jnp.logical_and(col >= 2 * H, col < 3 * H)
    scale = jnp.where(is_g, 1.0, 0.5).astype(jnp.float32)
    shift = jnp.where(is_g, 0.0, 0.5).astype(jnp.float32)

    whh = whh_ref[...]                     # (H, 4H) bf16, resident in VMEM

    def step(t, carry):
        _, h_bf, c_prev = carry
        gates = xw_ref[t] + jnp.dot(h_bf, whh,
                                    preferred_element_type=jnp.float32)
        act = jnp.tanh(gates * scale) * scale + shift
        i_g = act[:, 0 * H:1 * H]
        f_g = act[:, 1 * H:2 * H]
        g_g = act[:, 2 * H:3 * H]
        o_g = act[:, 3 * H:4 * H]
        c_new = f_g * c_prev + i_g * g_g
        h_new = o_g * jnp.tanh(c_new)
        h_new_bf = h_new.astype(jnp.bfloat16)
        hbuf_ref[t] = h_new_bf             # stash for the batched head matmul
        return h_new, h_new_bf, c_new

    h_fin, _, c_fin = jax.lax.fori_loop(
        0, T, step,
        (hx0_ref[...], hx0_ref[...].astype(jnp.bfloat16), cx0_ref[...]),
        unroll=True)

    h_ref[...] = h_fin
    c_ref[...] = c_fin

    # ---- Batched pi|v head: one (T*blk, H) x (H, 128) matmul + a single
    #      lane-dense bulk store instead of T tiny matmuls/stores. ----
    h_all = hbuf_ref[...].reshape(T * blk, H)
    head2 = jnp.dot(h_all, whead_ref[...], preferred_element_type=jnp.float32)
    head_ref[...] = (head2 + bh_ref[...]).reshape(T, blk, n_head)


def lstm_policy_forward_seq(x_seq, embed_seq, hx, cx, params, *, block_b=None):
    """Run T LSTM-policy steps inside a single pallas_call.

    x_seq     : (T, B, input_size)
    embed_seq : (T, B, output_size + 3)
    hx, cx    : (B, lstm_size)
    Returns (logits (T,B,out), value (T,B,1), h (B,H), c (B,H)).
    """
    T, B, IN = x_seq.shape
    E = embed_seq.shape[-1]
    H = hx.shape[-1]
    D = IN + E
    out_size = params["output_size"]
    n_head = params["w_head"].shape[-1]

    # One-time concat in the wrapper (not per step inside the kernel).
    xe_seq = jnp.concatenate([x_seq, embed_seq], axis=-1)

    # Pad the batch to a multiple of 8 sublanes so in-kernel reshapes are
    # layout-aligned; padded rows are sliced off below.
    B_orig = B
    if B % 8 != 0:
        pad = 8 - B % 8
        xe_seq = jnp.pad(xe_seq, ((0, 0), (0, pad), (0, 0)))
        hx = jnp.pad(hx, ((0, pad), (0, 0)))
        cx = jnp.pad(cx, ((0, pad), (0, 0)))
        B = B + pad

    if block_b is None:
        # Single batch block: v5e/v6e have one TensorCore, so splitting the
        # batch only adds grid overhead.  On v7x pass block_b = B // 2 to feed
        # both TensorCores via the "parallel" grid axis.
        block_b = B
    assert B % block_b == 0 and block_b % 8 == 0, \
        "batch block must divide the (8-padded) batch and be a multiple of 8"
    n_b = B // block_b

    in_specs = [
        pl.BlockSpec((T, block_b, D), lambda p: (0, p, 0)),       # xe (time-resident)
        pl.BlockSpec((block_b, H), lambda p: (p, 0)),             # hx0
        pl.BlockSpec((block_b, H), lambda p: (p, 0)),             # cx0
        pl.BlockSpec((D, 4 * H), lambda p: (0, 0)),               # W_xe (resident)
        pl.BlockSpec((H, 4 * H), lambda p: (0, 0)),               # W_hh (resident)
        pl.BlockSpec((1, 4 * H), lambda p: (0, 0)),               # b_gates
        pl.BlockSpec((H, n_head), lambda p: (0, 0)),              # W_head (resident)
        pl.BlockSpec((1, n_head), lambda p: (0, 0)),              # b_head
    ]
    out_specs = (
        pl.BlockSpec((T, block_b, n_head), lambda p: (0, p, 0)),  # fused pi|v head
        pl.BlockSpec((block_b, H), lambda p: (p, 0)),             # final h
        pl.BlockSpec((block_b, H), lambda p: (p, 0)),             # final c
    )
    out_shapes = (
        jax.ShapeDtypeStruct((T, B, n_head), jnp.float32),
        jax.ShapeDtypeStruct((B, H), jnp.float32),
        jax.ShapeDtypeStruct((B, H), jnp.float32),
    )

    flops = 2 * T * B * (D * 4 * H + H * 4 * H + H * n_head)
    transcendentals = 5 * T * B * H
    bytes_accessed = int(
        (xe_seq.size + hx.size + cx.size) * 4
        + (params["w_xe"].size + params["w_hh"].size + params["w_head"].size) * 2
        + (params["b_gates"].size + params["b_head"].size) * 4
        + (T * B * n_head + 2 * B * H) * 4)

    head, h, c = pl.pallas_call(
        _lstm_policy_seq_kernel,
        grid=(n_b,),
        in_specs=in_specs,
        out_specs=out_specs,
        out_shape=out_shapes,
        scratch_shapes=[
            pltpu.VMEM((T, block_b, 4 * H), jnp.float32),   # precomputed xe @ W_xe + b
            pltpu.VMEM((T, block_b, H), jnp.bfloat16),      # h history for batched head
        ],
        compiler_params=pltpu.CompilerParams(
            dimension_semantics=("parallel",)),
        cost_estimate=pl.CostEstimate(flops=flops,
                                      transcendentals=transcendentals,
                                      bytes_accessed=bytes_accessed),
    )(xe_seq, hx, cx,
      params["w_xe"], params["w_hh"], params["b_gates"],
      params["w_head"], params["b_head"])

    logits = head[:, :B_orig, :out_size]
    value = head[:, :B_orig, out_size:out_size + 1]
    return logits, value, h[:B_orig], c[:B_orig]


def lstm_policy_forward(x, embed, hx, cx, params):
    """Single-step path matching LSTMPolicy.forward (T == 1)."""
    logits, value, h, c = lstm_policy_forward_seq(x[None], embed[None], hx, cx, params)
    # TODO(synk): Categorical(logits=...) has no kernel equivalent; return logits.
    return logits[0], value[0], h, c


def init_params(key, input_size, output_size, lstm_size):
    """Deterministic synthetic init matching LSTMPolicy.__init__ shapes."""
    d_in = input_size + output_size + 3
    ks = jax.random.split(key, 8)
    scale = 1.0 / jnp.sqrt(jnp.float32(lstm_size))
    u = lambda k, shape: jax.random.uniform(k, shape, jnp.float32, -scale, scale)
    # PyTorch stores W_ih (4H, D_in), W_hh (4H, H); we keep them transposed.
    w_ih_t = u(ks[0], (d_in, 4 * lstm_size))
    w_hh_t = u(ks[1], (lstm_size, 4 * lstm_size))
    b_ih = u(ks[2], (1, 4 * lstm_size))
    b_hh = u(ks[3], (1, 4 * lstm_size))
    w_pi_t = u(ks[4], (lstm_size, output_size))
    b_pi = u(ks[5], (1, output_size))
    w_v_t = u(ks[6], (lstm_size, 1))
    b_v = u(ks[7], (1, 1))

    # Fused pi|v head, zero-padded to a lane-dense multiple of 128 columns.
    n_head = ((output_size + 1 + 127) // 128) * 128
    w_head = jnp.zeros((lstm_size, n_head), jnp.float32)
    w_head = w_head.at[:, :output_size].set(w_pi_t)
    w_head = w_head.at[:, output_size:output_size + 1].set(w_v_t)
    b_head = jnp.zeros((1, n_head), jnp.float32)
    b_head = b_head.at[:, :output_size].set(b_pi)
    b_head = b_head.at[:, output_size:output_size + 1].set(b_v)

    return {
        "output_size": output_size,
        # Fused kernel params (bf16 weights on the MXU operand path).
        "w_xe": w_ih_t.astype(jnp.bfloat16),
        "w_hh": w_hh_t.astype(jnp.bfloat16),
        "b_gates": b_ih + b_hh,
        "w_head": w_head.astype(jnp.bfloat16),
        "b_head": b_head,
        # Raw f32 params for the pure-JAX references.
        "w_ih_t": w_ih_t, "w_hh_t": w_hh_t, "b_ih": b_ih, "b_hh": b_hh,
        "w_pi_t": w_pi_t, "b_pi": b_pi, "w_v_t": w_v_t, "b_v": b_v,
    }


def reference_forward_seq(x_seq, embed_seq, hx, cx, params, *,
                          matmul_dtype=jnp.float32):
    """Pure-JAX reference (mirrors PyTorch LSTMCell semantics, scanned over T).

    matmul_dtype=bfloat16 mimics the kernel's bf16-operand / f32-accumulate
    matmuls; float32 is the exact PyTorch-equivalent math.
    """
    H = hx.shape[-1]
    b_gates = params["b_ih"] + params["b_hh"]
    w_cat = jnp.concatenate([params["w_ih_t"], params["w_hh_t"]], axis=0)

    def mm(a, b):
        return jnp.dot(a.astype(matmul_dtype), b.astype(matmul_dtype),
                       preferred_element_type=jnp.float32)

    def step(carry, xt_et):
        h, c = carry
        xt, et = xt_et
        xe = jnp.concatenate([xt, et, h], axis=-1)
        gates = mm(xe, w_cat) + b_gates
        i = jax.nn.sigmoid(gates[:, 0 * H:1 * H])
        f = jax.nn.sigmoid(gates[:, 1 * H:2 * H])
        g = jnp.tanh(gates[:, 2 * H:3 * H])
        o = jax.nn.sigmoid(gates[:, 3 * H:4 * H])
        c = f * c + i * g
        h = o * jnp.tanh(c)
        logits = mm(h, params["w_pi_t"]) + params["b_pi"]
        value = mm(h, params["w_v_t"]) + params["b_v"]
        return (h, c), (logits, value)

    (h, c), (logits, value) = jax.lax.scan(step, (hx, cx), (x_seq, embed_seq))
    return logits, value, h, c


if __name__ == "__main__":
    # Small, forward-consistent shapes: batch 16 (one 8-aligned batch block),
    # T = 8 rollout steps, LSTM hidden 32 (4H = 128 lanes -> one gates vreg).
    B = 16
    T = 8
    input_size = 16
    output_size = 5
    lstm_size = 32

    key = jax.random.PRNGKey(0)
    k_x, k_e, k_h, k_c, k_p = jax.random.split(key, 5)

    x_seq = jax.random.normal(k_x, (T, B, input_size), jnp.float32)
    embed_seq = jax.random.normal(k_e, (T, B, output_size + 3), jnp.float32)
    hx = jax.random.normal(k_h, (B, lstm_size), jnp.float32)
    cx = jax.random.normal(k_c, (B, lstm_size), jnp.float32)
    params = init_params(k_p, input_size, output_size, lstm_size)

    # Multi-step rollout inside a single pallas_call.
    logits, value, h, c = lstm_policy_forward_seq(x_seq, embed_seq, hx, cx, params)
    jax.block_until_ready((logits, value, h, c))

    # (a) Tight check vs a reference that mirrors the kernel's bf16 matmuls.
    ref_bf16 = reference_forward_seq(x_seq, embed_seq, hx, cx, params,
                                     matmul_dtype=jnp.bfloat16)
    for got, want in zip((logits, value, h, c), ref_bf16):
        err = float(jnp.max(jnp.abs(got - want)))
        assert jnp.allclose(got, want, atol=2e-3, rtol=2e-3), err

    # (b) Sanity check vs the full-f32 PyTorch-equivalent reference
    #     (only difference is bf16 operand rounding on the MXU).
    ref_f32 = reference_forward_seq(x_seq, embed_seq, hx, cx, params,
                                    matmul_dtype=jnp.float32)
    for got, want in zip((logits, value, h, c), ref_f32):
        assert jnp.allclose(got, want, atol=1e-1, rtol=1e-1)

    # Single-step path == original LSTMPolicy.forward.
    logits1, value1, h1, c1 = lstm_policy_forward(x_seq[0], embed_seq[0], hx, cx, params)
    ref1 = reference_forward_seq(x_seq[:1], embed_seq[:1], hx, cx, params,
                                 matmul_dtype=jnp.bfloat16)
    assert jnp.allclose(logits1, ref1[0][0], atol=2e-3, rtol=2e-3)
    assert jnp.allclose(value1, ref1[1][0], atol=2e-3, rtol=2e-3)
    assert jnp.allclose(h1, ref1[2], atol=2e-3, rtol=2e-3)
    assert jnp.allclose(c1, ref1[3], atol=2e-3, rtol=2e-3)

    print("KERNEL_OK")
</pallas_src>

<mosaic_0001>
module attributes {stable_mosaic.version = 11 : i64} {
  func.func @_lstm_policy_seq_kernel(%arg0: i32, %arg1: memref<8x16x24xf32, #tpu.memory_space<vmem>>, %arg2: memref<16x32xf32, #tpu.memory_space<vmem>>, %arg3: memref<16x32xf32, #tpu.memory_space<vmem>>, %arg4: memref<24x128xbf16, #tpu.memory_space<vmem>>, %arg5: memref<32x128xbf16, #tpu.memory_space<vmem>>, %arg6: memref<1x128xf32, #tpu.memory_space<vmem>>, %arg7: memref<32x128xbf16, #tpu.memory_space<vmem>>, %arg8: memref<1x128xf32, #tpu.memory_space<vmem>>, %arg9: memref<8x16x128xf32, #tpu.memory_space<vmem>>, %arg10: memref<16x32xf32, #tpu.memory_space<vmem>>, %arg11: memref<16x32xf32, #tpu.memory_space<vmem>>, %arg12: memref<8x16x128xf32, #tpu.memory_space<vmem>>, %arg13: memref<8x16x32xbf16, #tpu.memory_space<vmem>>) attributes {dimension_semantics = [#tpu.dimension_semantics<parallel>], iteration_bounds = array<i64: 1>, scalar_prefetch = 0 : i64, scratch_operands = 2 : i64, tpu.core_type = #tpu.core_type<tc>, window_params = [{transform_indices = @transform_0, window_bounds = array<i64: 8, 16, 24>}, {transform_indices = @transform_1, window_bounds = array<i64: 16, 32>}, {transform_indices = @transform_2, window_bounds = array<i64: 16, 32>}, {pipeline_mode = #tpu.pipeline_mode<synchronous>, transform_indices = @transform_3, window_bounds = array<i64: 24, 128>}, {pipeline_mode = #tpu.pipeline_mode<synchronous>, transform_indices = @transform_4, window_bounds = array<i64: 32, 128>}, {pipeline_mode = #tpu.pipeline_mode<synchronous>, transform_indices = @transform_5, window_bounds = array<i64: 1, 128>}, {pipeline_mode = #tpu.pipeline_mode<synchronous>, transform_indices = @transform_6, window_bounds = array<i64: 32, 128>}, {pipeline_mode = #tpu.pipeline_mode<synchronous>, transform_indices = @transform_7, window_bounds = array<i64: 1, 128>}, {transform_indices = @transform_8, window_bounds = array<i64: 8, 16, 128>}, {transform_indices = @transform_9, window_bounds = array<i64: 16, 32>}, {transform_indices = @transform_10, window_bounds = array<i64: 16, 32>}]} {
    %c0 = arith.constant 0 : index
    %c0_0 = arith.constant 0 : index
    %c0_1 = arith.constant 0 : index
    %0 = vector.load %arg1[%c0, %c0_0, %c0_1] : memref<8x16x24xf32, #tpu.memory_space<vmem>>, vector<8x16x24xf32>
    %1 = vector.shape_cast %0 : vector<8x16x24xf32> to vector<128x24xf32>
    %2 = arith.truncf %1 : vector<128x24xf32> to vector<128x24xbf16>
    %c0_2 = arith.constant 0 : index
    %c0_3 = arith.constant 0 : index
    %3 = vector.load %arg4[%c0_2, %c0_3] : memref<24x128xbf16, #tpu.memory_space<vmem>>, vector<24x128xbf16>
    %cst = arith.constant dense<0.000000e+00> : vector<128x128xf32>
    %4 = tpu.matmul %2, %3, %cst {dimension_numbers = #tpu.dot_dimension_numbers<[1], [0], [0], [1], [0, 0, 1, 1], [], []>} : vector<128x24xbf16>, vector<24x128xbf16>, vector<128x128xf32> -> vector<128x128xf32>
    %c0_4 = arith.constant 0 : index
    %c0_5 = arith.constant 0 : index
    %5 = vector.load %arg6[%c0_4, %c0_5] : memref<1x128xf32, #tpu.memory_space<vmem>>, vector<1x128xf32>
    %6 = vector.broadcast %5 : vector<1x128xf32> to vector<128x128xf32>
    %7 = arith.addf %4, %6 : vector<128x128xf32>
    %8 = vector.shape_cast %7 : vector<128x128xf32> to vector<8x16x128xf32>
    %c0_6 = arith.constant 0 : index
    %c0_7 = arith.constant 0 : index
    %c0_8 = arith.constant 0 : index
    %9 = vector.load %arg12[%c0_6, %c0_7, %c0_8] : memref<8x16x128xf32, #tpu.memory_space<vmem>>, vector<8x16x128xf32>
    tpu.vector_store %arg12[%c0_6, %c0_7, %c0_8], %8 {strides = array<i32>} : memref<8x16x128xf32, #tpu.memory_space<vmem>>, vector<8x16x128xf32>,
    %10 = tpu.iota {dimensions = array<i32: 1>} : vector<1x128xi32>
    %c64_i32 = arith.constant 64 : i32
    %11 = vector.broadcast %c64_i32 : i32 to vector<1x128xi32>
    %12 = arith.cmpi sge, %10, %11 : vector<1x128xi32>
    %c96_i32 = arith.constant 96 : i32
    %13 = vector.broadcast %c96_i32 : i32 to vector<1x128xi32>
    %14 = arith.cmpi slt, %10, %13 : vector<1x128xi32>
    %15 = arith.andi %12, %14 : vector<1x128xi1>
    %cst_9 = arith.constant 1.000000e+00 : f32
    %cst_10 = arith.constant 5.000000e-01 : f32
    %16 = vector.broadcast %cst_9 : f32 to vector<1x128xf32>
    %17 = vector.broadcast %cst_10 : f32 to vector<1x128xf32>
    %18 = arith.select %15, %16, %17 : vector<1x128xi1>, vector<1x128xf32>
    %cst_11 = arith.constant 0.000000e+00 : f32
    %cst_12 = arith.constant 5.000000e-01 : f32
    %19 = vector.broadcast %cst_11 : f32 to vector<1x128xf32>
    %20 = vector.broadcast %cst_12 : f32 to vector<1x128xf32>
    %21 = arith.select %15, %19, %20 : vector<1x128xi1>, vector<1x128xf32>
    %c0_13 = arith.constant 0 : index
    %c0_14 = arith.constant 0 : index
    %22 = vector.load %arg5[%c0_13, %c0_14] : memref<32x128xbf16, #tpu.memory_space<vmem>>, vector<32x128xbf16>
    %c0_15 = arith.constant 0 : index
    %c0_16 = arith.constant 0 : index
    %23 = vector.load %arg2[%c0_15, %c0_16] : memref<16x32xf32, #tpu.memory_space<vmem>>, vector<16x32xf32>
    %c0_17 = arith.constant 0 : index
    %c0_18 = arith.constant 0 : index
    %24 = vector.load %arg2[%c0_17, %c0_18] : memref<16x32xf32, #tpu.memory_space<vmem>>, vector<16x32xf32>
    %25 = arith.truncf %24 : vector<16x32xf32> to vector<16x32xbf16>
    %c0_19 = arith.constant 0 : index
    %c0_20 = arith.constant 0 : index
    %26 = vector.load %arg3[%c0_19, %c0_20] : memref<16x32xf32, #tpu.memory_space<vmem>>, vector<16x32xf32>
    %c0_i32 = arith.constant 0 : i32
    %27 = arith.index_cast %c0_i32 : i32 to index
    %c0_21 = arith.constant 0 : index
    %c0_22 = arith.constant 0 : index
    %28 = vector.load %arg12[%27, %c0_21, %c0_22] : memref<8x16x128xf32, #tpu.memory_space<vmem>>, vector<1x16x128xf32>
    %29 = vector.shape_cast %28 : vector<1x16x128xf32> to vector<16x128xf32>
    %cst_23 = arith.constant dense<0.000000e+00> : vector<16x128xf32>
    %30 = tpu.matmul %25, %22, %cst_23 {dimension_numbers = #tpu.dot_dimension_numbers<[1], [0], [0], [1], [0, 0, 1, 1], [], []>} : vector<16x32xbf16>, vector<32x128xbf16>, vector<16x128xf32> -> vector<16x128xf32>
    %31 = arith.addf %29, %30 : vector<16x128xf32>
    %32 = vector.broadcast %18 : vector<1x128xf32> to vector<16x128xf32>
    %33 = arith.mulf %31, %32 : vector<16x128xf32>
    %34 = math.tanh %33 : vector<16x128xf32>
    %35 = vector.broadcast %18 : vector<1x128xf32> to vector<16x128xf32>
    %36 = arith.mulf %34, %35 : vector<16x128xf32>
    %37 = vector.broadcast %21 : vector<1x128xf32> to vector<16x128xf32>
    %38 = arith.addf %36, %37 : vector<16x128xf32>
    %39 = vector.extract_strided_slice %38 {offsets = [0, 0], sizes = [16, 32], strides = [1, 1]} : vector<16x128xf32> to vector<16x32xf32>
    %40 = vector.extract_strided_slice %38 {offsets = [0, 32], sizes = [16, 32], strides = [1, 1]} : vector<16x128xf32> to vector<16x32xf32>
    %41 = vector.extract_strided_slice %38 {offsets = [0, 64], sizes = [16, 32], strides = [1, 1]} : vector<16x128xf32> to vector<16x32xf32>
    %42 = vector.extract_strided_slice %38 {offsets = [0, 96], sizes = [16, 32], strides = [1, 1]} : vector<16x128xf32> to vector<16x32xf32>
    %43 = arith.mulf %40, %26 : vector<16x32xf32>
    %44 = arith.mulf %39, %41 : vector<16x32xf32>
    %45 = arith.addf %43, %44 : vector<16x32xf32>
    %46 = math.tanh %45 : vector<16x32xf32>
    %47 = arith.mulf %42, %46 : vector<16x32xf32>
    %48 = arith.truncf %47 : vector<16x32xf32> to vector<16x32xbf16>
    %49 = arith.index_cast %c0_i32 : i32 to index
    %c0_24 = arith.constant 0 : index
    %c0_25 = arith.constant 0 : index
    %50 = vector.load %arg13[%49, %c0_24, %c0_25] : memref<8x16x32xbf16, #tpu.memory_space<vmem>>, vector<1x16x32xbf16>
    %51 = vector.shape_cast %50 : vector<1x16x32xbf16> to vector<16x32xbf16>
    %52 = vector.shape_cast %48 : vector<16x32xbf16> to vector<1x16x32xbf16>
    tpu.vector_store %arg13[%49, %c0_24, %c0_25], %52 {strides = array<i32>} : memref<8x16x32xbf16, #tpu.memory_space<vmem>>, vector<1x16x32xbf16>,
    %c1_i32 = arith.constant 1 : i32
    %53 = arith.index_cast %c1_i32 : i32 to index
    %c0_26 = arith.constant 0 : index
    %c0_27 = arith.constant 0 : index
    %54 = vector.load %arg12[%53, %c0_26, %c0_27] : memref<8x16x128xf32, #tpu.memory_space<vmem>>, vector<1x16x128xf32>
    %55 = vector.shape_cast %54 : vector<1x16x128xf32> to vector<16x128xf32>
    %cst_28 = arith.constant dense<0.000000e+00> : vector<16x128xf32>
    %56 = tpu.matmul %48, %22, %cst_28 {dimension_numbers = #tpu.dot_dimension_numbers<[1], [0], [0], [1], [0, 0, 1, 1], [], []>} : vector<16x32xbf16>, vector<32x128xbf16>, vector<16x128xf32> -> vector<16x128xf32>
    %57 = arith.addf %55, %56 : vector<16x128xf32>
    %58 = vector.broadcast %18 : vector<1x128xf32> to vector<16x128xf32>
    %59 = arith.mulf %57, %58 : vector<16x128xf32>
    %60 = math.tanh %59 : vector<16x128xf32>
    %61 = vector.broadcast %18 : vector<1x128xf32> to vector<16x128xf32>
    %62 = arith.mulf %60, %61 : vector<16x128xf32>
    %63 = vector.broadcast %21 : vector<1x128xf32> to vector<16x128xf32>
    %64 = arith.addf %62, %63 : vector<16x128xf32>
    %65 = vector.extract_strided_slice %64 {offsets = [0, 0], sizes = [16, 32], strides = [1, 1]} : vector<16x128xf32> to vector<16x32xf32>
    %66 = vector.extract_strided_slice %64 {offsets = [0, 32], sizes = [16, 32], strides = [1, 1]} : vector<16x128xf32> to vector<16x32xf32>
    %67 = vector.extract_strided_slice %64 {offsets = [0, 64], sizes = [16, 32], strides = [1, 1]} : vector<16x128xf32> to vector<16x32xf32>
    %68 = vector.extract_strided_slice %64 {offsets = [0, 96], sizes = [16, 32], strides = [1, 1]} : vector<16x128xf32> to vector<16x32xf32>
    %69 = arith.mulf %66, %45 : vector<16x32xf32>
    %70 = arith.mulf %65, %67 : vector<16x32xf32>
    %71 = arith.addf %69, %70 : vector<16x32xf32>
    %72 = math.tanh %71 : vector<16x32xf32>
    %73 = arith.mulf %68, %72 : vector<16x32xf32>
    %74 = arith.truncf %73 : vector<16x32xf32> to vector<16x32xbf16>
    %75 = arith.index_cast %c1_i32 : i32 to index
    %c0_29 = arith.constant 0 : index
    %c0_30 = arith.constant 0 : index
    %76 = vector.load %arg13[%75, %c0_29, %c0_30] : memref<8x16x32xbf16, #tpu.memory_space<vmem>>, vector<1x16x32xbf16>
    %77 = vector.shape_cast %76 : vector<1x16x32xbf16> to vector<16x32xbf16>
    %78 = vector.shape_cast %74 : vector<16x32xbf16> to vector<1x16x32xbf16>
    tpu.vector_store %arg13[%75, %c0_29, %c0_30], %78 {strides = array<i32>} : memref<8x16x32xbf16, #tpu.memory_space<vmem>>, vector<1x16x32xbf16>,
    %c2_i32 = arith.constant 2 : i32
    %79 = arith.index_cast %c2_i32 : i32 to index
    %c0_31 = arith.constant 0 : index
    %c0_32 = arith.constant 0 : index
    %80 = vector.load %arg12[%79, %c0_31, %c0_32] : memref<8x16x128xf32, #tpu.memory_space<vmem>>, vector<1x16x128xf32>
    %81 = vector.shape_cast %80 : vector<1x16x128xf32> to vector<16x128xf32>
    %cst_33 = arith.constant dense<0.000000e+00> : vector<16x128xf32>
    %82 = tpu.matmul %74, %22, %cst_33 {dimension_numbers = #tpu.dot_dimension_numbers<[1], [0], [0], [1], [0, 0, 1, 1], [], []>} : vector<16x32xbf16>, vector<32x128xbf16>, vector<16x128xf32> -> vector<16x128xf32>
    %83 = arith.addf %81, %82 : vector<16x128xf32>
    %84 = vector.broadcast %18 : vector<1x128xf32> to vector<16x128xf32>
    %85 = arith.mulf %83, %84 : vector<16x128xf32>
    %86 = math.tanh %85 : vector<16x128xf32>
    %87 = vector.broadcast %18 : vector<1x128xf32> to vector<16x128xf32>
    %88 = arith.mulf %86, %87 : vector<16x128xf32>
    %89 = vector.broadcast %21 : vector<1x128xf32> to vector<16x128xf32>
    %90 = arith.addf %88, %89 : vector<16x128xf32>
    %91 = vector.extract_strided_slice %90 {offsets = [0, 0], sizes = [16, 32], strides = [1, 1]} : vector<16x128xf32> to vector<16x32xf32>
    %92 = vector.extract_strided_slice %90 {offsets = [0, 32], sizes = [16, 32], strides = [1, 1]} : vector<16x128xf32> to vector<16x32xf32>
    %93 = vector.extract_strided_slice %90 {offsets = [0, 64], sizes = [16, 32], strides = [1, 1]} : vector<16x128xf32> to vector<16x32xf32>
    %94 = vector.extract_strided_slice %90 {offsets = [0, 96], sizes = [16, 32], strides = [1, 1]} : vector<16x128xf32> to vector<16x32xf32>
    %95 = arith.mulf %92, %71 : vector<16x32xf32>
    %96 = arith.mulf %91, %93 : vector<16x32xf32>
    %97 = arith.addf %95, %96 : vector<16x32xf32>
    %98 = math.tanh %97 : vector<16x32xf32>
    %99 = arith.mulf %94, %98 : vector<16x32xf32>
    %100 = arith.truncf %99 : vector<16x32xf32> to vector<16x32xbf16>
    %101 = arith.index_cast %c2_i32 : i32 to index
    %c0_34 = arith.constant 0 : index
    %c0_35 = arith.constant 0 : index
    %102 = vector.load %arg13[%101, %c0_34, %c0_35] : memref<8x16x32xbf16, #tpu.memory_space<vmem>>, vector<1x16x32xbf16>
    %103 = vector.shape_cast %102 : vector<1x16x32xbf16> to vector<16x32xbf16>
    %104 = vector.shape_cast %100 : vector<16x32xbf16> to vector<1x16x32xbf16>
    tpu.vector_store %arg13[%101, %c0_34, %c0_35], %104 {strides = array<i32>} : memref<8x16x32xbf16, #tpu.memory_space<vmem>>, vector<1x16x32xbf16>,
    %c3_i32 = arith.constant 3 : i32
    %105 = arith.index_cast %c3_i32 : i32 to index
    %c0_36 = arith.constant 0 : index
    %c0_37 = arith.constant 0 : index
    %106 = vector.load %arg12[%105, %c0_36, %c0_37] : memref<8x16x128xf32, #tpu.memory_space<vmem>>, vector<1x16x128xf32>
    %107 = vector.shape_cast %106 : vector<1x16x128xf32> to vector<16x128xf32>
    %cst_38 = arith.constant dense<0.000000e+00> : vector<16x128xf32>
    %108 = tpu.matmul %100, %22, %cst_38 {dimension_numbers = #tpu.dot_dimension_numbers<[1], [0], [0], [1], [0, 0, 1, 1], [], []>} : vector<16x32xbf16>, vector<32x128xbf16>, vector<16x128xf32> -> vector<16x128xf32>
    %109 = arith.addf %107, %108 : vector<16x128xf32>
    %110 = vector.broadcast %18 : vector<1x128xf32> to vector<16x128xf32>
    %111 = arith.mulf %109, %110 : vector<16x128xf32>
    %112 = math.tanh %111 : vector<16x128xf32>
    %113 = vector.broadcast %18 : vector<1x128xf32> to vector<16x128xf32>
    %114 = arith.mulf %112, %113 : vector<16x128xf32>
    %115 = vector.broadcast %21 : vector<1x128xf32> to vector<16x128xf32>
    %116 = arith.addf %114, %115 : vector<16x128xf32>
    %117 = vector.extract_strided_slice %116 {offsets = [0, 0], sizes = [16, 32], strides = [1, 1]} : vector<16x128xf32> to vector<16x32xf32>
    %118 = vector.extract_strided_slice %116 {offsets = [0, 32], sizes = [16, 32], strides = [1, 1]} : vector<16x128xf32> to vector<16x32xf32>
    %119 = vector.extract_strided_slice %116 {offsets = [0, 64], sizes = [16, 32], strides = [1, 1]} : vector<16x128xf32> to vector<16x32xf32>
    %120 = vector.extract_strided_slice %116 {offsets = [0, 96], sizes = [16, 32], strides = [1, 1]} : vector<16x128xf32> to vector<16x32xf32>
    %121 = arith.mulf %118, %97 : vector<16x32xf32>
    %122 = arith.mulf %117, %119 : vector<16x32xf32>
    %123 = arith.addf %121, %122 : vector<16x32xf32>
    %124 = math.tanh %123 : vector<16x32xf32>
    %125 = arith.mulf %120, %124 : vector<16x32xf32>
    %126 = arith.truncf %125 : vector<16x32xf32> to vector<16x32xbf16>
    %127 = arith.index_cast %c3_i32 : i32 to index
    %c0_39 = arith.constant 0 : index
    %c0_40 = arith.constant 0 : index
    %128 = vector.load %arg13[%127, %c0_39, %c0_40] : memref<8x16x32xbf16, #tpu.memory_space<vmem>>, vector<1x16x32xbf16>
    %129 = vector.shape_cast %128 : vector<1x16x32xbf16> to vector<16x32xbf16>
    %130 = vector.shape_cast %126 : vector<16x32xbf16> to vector<1x16x32xbf16>
    tpu.vector_store %arg13[%127, %c0_39, %c0_40], %130 {strides = array<i32>} : memref<8x16x32xbf16, #tpu.memory_space<vmem>>, vector<1x16x32xbf16>,
    %c4_i32 = arith.constant 4 : i32
    %131 = arith.index_cast %c4_i32 : i32 to index
    %c0_41 = arith.constant 0 : index
    %c0_42 = arith.constant 0 : index
    %132 = vector.load %arg12[%131, %c0_41, %c0_42] : memref<8x16x128xf32, #tpu.memory_space<vmem>>, vector<1x16x128xf32>
    %133 = vector.shape_cast %132 : vector<1x16x128xf32> to vector<16x128xf32>
    %cst_43 = arith.constant dense<0.000000e+00> : vector<16x128xf32>
    %134 = tpu.matmul %126, %22, %cst_43 {dimension_numbers = #tpu.dot_dimension_numbers<[1], [0], [0], [1], [0, 0, 1, 1], [], []>} : vector<16x32xbf16>, vector<32x128xbf16>, vector<16x128xf32> -> vector<16x128xf32>
    %135 = arith.addf %133, %134 : vector<16x128xf32>
    %136 = vector.broadcast %18 : vector<1x128xf32> to vector<16x128xf32>
    %137 = arith.mulf %135, %136 : vector<16x128xf32>
    %138 = math.tanh %137 : vector<16x128xf32>
    %139 = vector.broadcast %18 : vector<1x128xf32> to vector<16x128xf32>
    %140 = arith.mulf %138, %139 : vector<16x128xf32>
    %141 = vector.broadcast %21 : vector<1x128xf32> to vector<16x128xf32>
    %142 = arith.addf %140, %141 : vector<16x128xf32>
    %143 = vector.extract_strided_slice %142 {offsets = [0, 0], sizes = [16, 32], strides = [1, 1]} : vector<16x128xf32> to vector<16x32xf32>
    %144 = vector.extract_strided_slice %142 {offsets = [0, 32], sizes = [16, 32], strides = [1, 1]} : vector<16x128xf32> to vector<16x32xf32>
    %145 = vector.extract_strided_slice %142 {offsets = [0, 64], sizes = [16, 32], strides = [1, 1]} : vector<16x128xf32> to vector<16x32xf32>
    %146 = vector.extract_strided_slice %142 {offsets = [0, 96], sizes = [16, 32], strides = [1, 1]} : vector<16x128xf32> to vector<16x32xf32>
    %147 = arith.mulf %144, %123 : vector<16x32xf32>
    %148 = arith.mulf %143, %145 : vector<16x32xf32>
    %149 = arith.addf %147, %148 : vector<16x32xf32>
    %150 = math.tanh %149 : vector<16x32xf32>
    %151 = arith.mulf %146, %150 : vector<16x32xf32>
    %152 = arith.truncf %151 : vector<16x32xf32> to vector<16x32xbf16>
    %153 = arith.index_cast %c4_i32 : i32 to index
    %c0_44 = arith.constant 0 : index
    %c0_45 = arith.constant 0 : index
    %154 = vector.load %arg13[%153, %c0_44, %c0_45] : memref<8x16x32xbf16, #tpu.memory_space<vmem>>, vector<1x16x32xbf16>
    %155 = vector.shape_cast %154 : vector<1x16x32xbf16> to vector<16x32xbf16>
    %156 = vector.shape_cast %152 : vector<16x32xbf16> to vector<1x16x32xbf16>
    tpu.vector_store %arg13[%153, %c0_44, %c0_45], %156 {strides = array<i32>} : memref<8x16x32xbf16, #tpu.memory_space<vmem>>, vector<1x16x32xbf16>,
    %c5_i32 = arith.constant 5 : i32
    %157 = arith.index_cast %c5_i32 : i32 to index
    %c0_46 = arith.constant 0 : index
    %c0_47 = arith.constant 0 : index
    %158 = vector.load %arg12[%157, %c0_46, %c0_47] : memref<8x16x128xf32, #tpu.memory_space<vmem>>, vector<1x16x128xf32>
    %159 = vector.shape_cast %158 : vector<1x16x128xf32> to vector<16x128xf32>
    %cst_48 = arith.constant dense<0.000000e+00> : vector<16x128xf32>
    %160 = tpu.matmul %152, %22, %cst_48 {dimension_numbers = #tpu.dot_dimension_numbers<[1], [0], [0], [1], [0, 0, 1, 1], [], []>} : vector<16x32xbf16>, vector<32x128xbf16>, vector<16x128xf32> -> vector<16x128xf32>
    %161 = arith.addf %159, %160 : vector<16x128xf32>
    %162 = vector.broadcast %18 : vector<1x128xf32> to vector<16x128xf32>
    %163 = arith.mulf %161, %162 : vector<16x128xf32>
    %164 = math.tanh %163 : vector<16x128xf32>
    %165 = vector.broadcast %18 : vector<1x128xf32> to vector<16x128xf32>
    %166 = arith.mulf %164, %165 : vector<16x128xf32>
    %167 = vector.broadcast %21 : vector<1x128xf32> to vector<16x128xf32>
    %168 = arith.addf %166, %167 : vector<16x128xf32>
    %169 = vector.extract_strided_slice %168 {offsets = [0, 0], sizes = [16, 32], strides = [1, 1]} : vector<16x128xf32> to vector<16x32xf32>
    %170 = vector.extract_strided_slice %168 {offsets = [0, 32], sizes = [16, 32], strides = [1, 1]} : vector<16x128xf32> to vector<16x32xf32>
    %171 = vector.extract_strided_slice %168 {offsets = [0, 64], sizes = [16, 32], strides = [1, 1]} : vector<16x128xf32> to vector<16x32xf32>
    %172 = vector.extract_strided_slice %168 {offsets = [0, 96], sizes = [16, 32], strides = [1, 1]} : vector<16x128xf32> to vector<16x32xf32>
    %173 = arith.mulf %170, %149 : vector<16x32xf32>
    %174 = arith.mulf %169, %171 : vector<16x32xf32>
    %175 = arith.addf %173, %174 : vector<16x32xf32>
    %176 = math.tanh %175 : vector<16x32xf32>
    %177 = arith.mulf %172, %176 : vector<16x32xf32>
    %178 = arith.truncf %177 : vector<16x32xf32> to vector<16x32xbf16>
    %179 = arith.index_cast %c5_i32 : i32 to index
    %c0_49 = arith.constant 0 : index
    %c0_50 = arith.constant 0 : index
    %180 = vector.load %arg13[%179, %c0_49, %c0_50] : memref<8x16x32xbf16, #tpu.memory_space<vmem>>, vector<1x16x32xbf16>
    %181 = vector.shape_cast %180 : vector<1x16x32xbf16> to vector<16x32xbf16>
    %182 = vector.shape_cast %178 : vector<16x32xbf16> to vector<1x16x32xbf16>
    tpu.vector_store %arg13[%179, %c0_49, %c0_50], %182 {strides = array<i32>} : memref<8x16x32xbf16, #tpu.memory_space<vmem>>, vector<1x16x32xbf16>,
    %c6_i32 = arith.constant 6 : i32
    %183 = arith.index_cast %c6_i32 : i32 to index
    %c0_51 = arith.constant 0 : index
    %c0_52 = arith.constant 0 : index
    %184 = vector.load %arg12[%183, %c0_51, %c0_52] : memref<8x16x128xf32, #tpu.memory_space<vmem>>, vector<1x16x128xf32>
    %185 = vector.shape_cast %184 : vector<1x16x128xf32> to vector<16x128xf32>
    %cst_53 = arith.constant dense<0.000000e+00> : vector<16x128xf32>
    %186 = tpu.matmul %178, %22, %cst_53 {dimension_numbers = #tpu.dot_dimension_numbers<[1], [0], [0], [1], [0, 0, 1, 1], [], []>} : vector<16x32xbf16>, vector<32x128xbf16>, vector<16x128xf32> -> vector<16x128xf32>
    %187 = arith.addf %185, %186 : vector<16x128xf32>
    %188 = vector.broadcast %18 : vector<1x128xf32> to vector<16x128xf32>
    %189 = arith.mulf %187, %188 : vector<16x128xf32>
    %190 = math.tanh %189 : vector<16x128xf32>
    %191 = vector.broadcast %18 : vector<1x128xf32> to vector<16x128xf32>
    %192 = arith.mulf %190, %191 : vector<16x128xf32>
    %193 = vector.broadcast %21 : vector<1x128xf32> to vector<16x128xf32>
    %194 = arith.addf %192, %193 : vector<16x128xf32>
    %195 = vector.extract_strided_slice %194 {offsets = [0, 0], sizes = [16, 32], strides = [1, 1]} : vector<16x128xf32> to vector<16x32xf32>
    %196 = vector.extract_strided_slice %194 {offsets = [0, 32], sizes = [16, 32], strides = [1, 1]} : vector<16x128xf32> to vector<16x32xf32>
    %197 = vector.extract_strided_slice %194 {offsets = [0, 64], sizes = [16, 32], strides = [1, 1]} : vector<16x128xf32> to vector<16x32xf32>
    %198 = vector.extract_strided_slice %194 {offsets = [0, 96], sizes = [16, 32], strides = [1, 1]} : vector<16x128xf32> to vector<16x32xf32>
    %199 = arith.mulf %196, %175 : vector<16x32xf32>
    %200 = arith.mulf %195, %197 : vector<16x32xf32>
    %201 = arith.addf %199, %200 : vector<16x32xf32>
    %202 = math.tanh %201 : vector<16x32xf32>
    %203 = arith.mulf %198, %202 : vector<16x32xf32>
    %204 = arith.truncf %203 : vector<16x32xf32> to vector<16x32xbf16>
    %205 = arith.index_cast %c6_i32 : i32 to index
    %c0_54 = arith.constant 0 : index
    %c0_55 = arith.constant 0 : index
    %206 = vector.load %arg13[%205, %c0_54, %c0_55] : memref<8x16x32xbf16, #tpu.memory_space<vmem>>, vector<1x16x32xbf16>
    %207 = vector.shape_cast %206 : vector<1x16x32xbf16> to vector<16x32xbf16>
    %208 = vector.shape_cast %204 : vector<16x32xbf16> to vector<1x16x32xbf16>
    tpu.vector_store %arg13[%205, %c0_54, %c0_55], %208 {strides = array<i32>} : memref<8x16x32xbf16, #tpu.memory_space<vmem>>, vector<1x16x32xbf16>,
    %c7_i32 = arith.constant 7 : i32
    %209 = arith.index_cast %c7_i32 : i32 to index
    %c0_56 = arith.constant 0 : index
    %c0_57 = arith.constant 0 : index
    %210 = vector.load %arg12[%209, %c0_56, %c0_57] : memref<8x16x128xf32, #tpu.memory_space<vmem>>, vector<1x16x128xf32>
    %211 = vector.shape_cast %210 : vector<1x16x128xf32> to vector<16x128xf32>
    %cst_58 = arith.constant dense<0.000000e+00> : vector<16x128xf32>
    %212 = tpu.matmul %204, %22, %cst_58 {dimension_numbers = #tpu.dot_dimension_numbers<[1], [0], [0], [1], [0, 0, 1, 1], [], []>} : vector<16x32xbf16>, vector<32x128xbf16>, vector<16x128xf32> -> vector<16x128xf32>
    %213 = arith.addf %211, %212 : vector<16x128xf32>
    %214 = vector.broadcast %18 : vector<1x128xf32> to vector<16x128xf32>
    %215 = arith.mulf %213, %214 : vector<16x128xf32>
    %216 = math.tanh %215 : vector<16x128xf32>
    %217 = vector.broadcast %18 : vector<1x128xf32> to vector<16x128xf32>
    %218 = arith.mulf %216, %217 : vector<16x128xf32>
    %219 = vector.broadcast %21 : vector<1x128xf32> to vector<16x128xf32>
    %220 = arith.addf %218, %219 : vector<16x128xf32>
    %221 = vector.extract_strided_slice %220 {offsets = [0, 0], sizes = [16, 32], strides = [1, 1]} : vector<16x128xf32> to vector<16x32xf32>
    %222 = vector.extract_strided_slice %220 {offsets = [0, 32], sizes = [16, 32], strides = [1, 1]} : vector<16x128xf32> to vector<16x32xf32>
    %223 = vector.extract_strided_slice %220 {offsets = [0, 64], sizes = [16, 32], strides = [1, 1]} : vector<16x128xf32> to vector<16x32xf32>
    %224 = vector.extract_strided_slice %220 {offsets = [0, 96], sizes = [16, 32], strides = [1, 1]} : vector<16x128xf32> to vector<16x32xf32>
    %225 = arith.mulf %222, %201 : vector<16x32xf32>
    %226 = arith.mulf %221, %223 : vector<16x32xf32>
    %227 = arith.addf %225, %226 : vector<16x32xf32>
    %228 = math.tanh %227 : vector<16x32xf32>
    %229 = arith.mulf %224, %228 : vector<16x32xf32>
    %230 = arith.truncf %229 : vector<16x32xf32> to vector<16x32xbf16>
    %231 = arith.index_cast %c7_i32 : i32 to index
    %c0_59 = arith.constant 0 : index
    %c0_60 = arith.constant 0 : index
    %232 = vector.load %arg13[%231, %c0_59, %c0_60] : memref<8x16x32xbf16, #tpu.memory_space<vmem>>, vector<1x16x32xbf16>
    %233 = vector.shape_cast %232 : vector<1x16x32xbf16> to vector<16x32xbf16>
    %234 = vector.shape_cast %230 : vector<16x32xbf16> to vector<1x16x32xbf16>
    tpu.vector_store %arg13[%231, %c0_59, %c0_60], %234 {strides = array<i32>} : memref<8x16x32xbf16, #tpu.memory_space<vmem>>, vector<1x16x32xbf16>,
    %c8_i32 = arith.constant 8 : i32
    %c0_61 = arith.constant 0 : index
    %c0_62 = arith.constant 0 : index
    %235 = vector.load %arg10[%c0_61, %c0_62] : memref<16x32xf32, #tpu.memory_space<vmem>>, vector<16x32xf32>
    tpu.vector_store %arg10[%c0_61, %c0_62], %229 {strides = array<i32>} : memref<16x32xf32, #tpu.memory_space<vmem>>, vector<16x32xf32>,
    %c0_63 = arith.constant 0 : index
    %c0_64 = arith.constant 0 : index
    %236 = vector.load %arg11[%c0_63, %c0_64] : memref<16x32xf32, #tpu.memory_space<vmem>>, vector<16x32xf32>
    tpu.vector_store %arg11[%c0_63, %c0_64], %227 {strides = array<i32>} : memref<16x32xf32, #tpu.memory_space<vmem>>, vector<16x32xf32>,
    %c0_65 = arith.constant 0 : index
    %c0_66 = arith.constant 0 : index
    %c0_67 = arith.constant 0 : index
    %237 = vector.load %arg13[%c0_65, %c0_66, %c0_67] : memref<8x16x32xbf16, #tpu.memory_space<vmem>>, vector<8x16x32xbf16>
    %238 = vector.shape_cast %237 : vector<8x16x32xbf16> to vector<128x32xbf16>
    %c0_68 = arith.constant 0 : index
    %c0_69 = arith.constant 0 : index
    %239 = vector.load %arg7[%c0_68, %c0_69] : memref<32x128xbf16, #tpu.memory_space<vmem>>, vector<32x128xbf16>
    %cst_70 = arith.constant dense<0.000000e+00> : vector<128x128xf32>
    %240 = tpu.matmul %238, %239, %cst_70 {dimension_numbers = #tpu.dot_dimension_numbers<[1], [0], [0], [1], [0, 0, 1, 1], [], []>} : vector<128x32xbf16>, vector<32x128xbf16>, vector<128x128xf32> -> vector<128x128xf32>
    %c0_71 = arith.constant 0 : index
    %c0_72 = arith.constant 0 : index
    %241 = vector.load %arg8[%c0_71, %c0_72] : memref<1x128xf32, #tpu.memory_space<vmem>>, vector<1x128xf32>
    %242 = vector.broadcast %241 : vector<1x128xf32> to vector<128x128xf32>
    %243 = arith.addf %240, %242 : vector<128x128xf32>
    %244 = vector.shape_cast %243 : vector<128x128xf32> to vector<8x16x128xf32>
    %c0_73 = arith.constant 0 : index
    %c0_74 = arith.constant 0 : index
    %c0_75 = arith.constant 0 : index
    %245 = vector.load %arg9[%c0_73, %c0_74, %c0_75] : memref<8x16x128xf32, #tpu.memory_space<vmem>>, vector<8x16x128xf32>
    tpu.vector_store %arg9[%c0_73, %c0_74, %c0_75], %244 {strides = array<i32>} : memref<8x16x128xf32, #tpu.memory_space<vmem>>, vector<8x16x128xf32>,
    return
  }
  func.func @transform_0(%arg0: i32) -> (i32, i32, i32) {
    %c0_i32 = arith.constant 0 : i32
    %c0_i32_0 = arith.constant 0 : i32
    %c0_i32_1 = arith.constant 0 : i32
    return %c0_i32, %arg0, %c0_i32_0 : i32, i32, i32
  }
  func.func @transform_1(%arg0: i32) -> (i32, i32) {
    %c0_i32 = arith.constant 0 : i32
    %c0_i32_0 = arith.constant 0 : i32
    return %arg0, %c0_i32 : i32, i32
  }
  func.func @transform_2(%arg0: i32) -> (i32, i32) {
    %c0_i32 = arith.constant 0 : i32
    %c0_i32_0 = arith.constant 0 : i32
    return %arg0, %c0_i32 : i32, i32
  }
  func.func @transform_3(%arg0: i32) -> (i32, i32) {
    %c0_i32 = arith.constant 0 : i32
    %c0_i32_0 = arith.constant 0 : i32
    %c0_i32_1 = arith.constant 0 : i32
    return %c0_i32, %c0_i32_0 : i32, i32
  }
  func.func @transform_4(%arg0: i32) -> (i32, i32) {
    %c0_i32 = arith.constant 0 : i32
    %c0_i32_0 = arith.constant 0 : i32
    %c0_i32_1 = arith.constant 0 : i32
    return %c0_i32, %c0_i32_0 : i32, i32
  }
  func.func @transform_5(%arg0: i32) -> (i32, i32) {
    %c0_i32 = arith.constant 0 : i32
    %c0_i32_0 = arith.constant 0 : i32
    %c0_i32_1 = arith.constant 0 : i32
    return %c0_i32, %c0_i32_0 : i32, i32
  }
  func.func @transform_6(%arg0: i32) -> (i32, i32) {
    %c0_i32 = arith.constant 0 : i32
    %c0_i32_0 = arith.constant 0 : i32
    %c0_i32_1 = arith.constant 0 : i32
    return %c0_i32, %c0_i32_0 : i32, i32
  }
  func.func @transform_7(%arg0: i32) -> (i32, i32) {
    %c0_i32 = arith.constant 0 : i32
    %c0_i32_0 = arith.constant 0 : i32
    %c0_i32_1 = arith.constant 0 : i32
    return %c0_i32, %c0_i32_0 : i32, i32
  }
  func.func @transform_8(%arg0: i32) -> (i32, i32, i32) {
    %c0_i32 = arith.constant 0 : i32
    %c0_i32_0 = arith.constant 0 : i32
    %c0_i32_1 = arith.constant 0 : i32
    return %c0_i32, %arg0, %c0_i32_0 : i32, i32, i32
  }
  func.func @transform_9(%arg0: i32) -> (i32, i32) {
    %c0_i32 = arith.constant 0 : i32
    %c0_i32_0 = arith.constant 0 : i32
    return %arg0, %c0_i32 : i32, i32
  }
  func.func @transform_10(%arg0: i32) -> (i32, i32) {
    %c0_i32 = arith.constant 0 : i32
    %c0_i32_0 = arith.constant 0 : i32
    return %arg0, %c0_i32 : i32, i32
  }
}

</mosaic_0001>

<bundles_post_ra>
// kernel: tpu_custom_call.1
= control target key start
LH: loop header
LB: loop body
LE: loop exit
PB: predicated region body
PF: predicated region fallthrough
CT: control target
= control target key end

     0   :  { %16 = vsyncpa [#allocation5], 0  ;;  %s2491_s0 = inlined_call_operand.hbm [shape: f32[8,16,24], index: 0, kind: input, shape index: {}]   ;;  %s2492_s1 = inlined_call_operand.hbm [shape: f32[16,32], index: 1, kind: input, shape index: {}]   ;;  %s2493_s2 = inlined_call_operand.hbm [shape: f32[16,32], index: 2, kind: input, shape index: {}]   ;;  %s2494_s3 = inlined_call_operand.hbm [shape: bf16[24,128], index: 3, kind: input, shape index: {}]   ;;  %s2495_s4 = inlined_call_operand.hbm [shape: bf16[32,128], index: 4, kind: input, shape index: {}]   ;;  %s2496_s5 = inlined_call_operand.vmem [shape: f32[1,128], index: 5, kind: input, shape index: {}]   ;;  %s2497_s6 = inlined_call_operand.hbm [shape: bf16[32,128], index: 6, kind: input, shape index: {}]   ;;  %s2498_s7 = inlined_call_operand.vmem [shape: f32[1,128], index: 7, kind: input, shape index: {}]   ;;  %s2499_s8 = inlined_call_operand.hbm [shape: f32[8,16,128], index: 8, kind: output, shape index: {0}]   ;;  %s2500_s9 = inlined_call_operand.hbm [shape: f32[16,32], index: 9, kind: output, shape index: {1}]   ;;  %s2501_s10 = inlined_call_operand.hbm [shape: f32[16,32], index: 10, kind: output, shape index: {2}]  }
   0x1   :  { %17 = vsyncpa [#allocation8], 0 }
   0x2   :  { %18 = vsyncpa [#allocation11], 0 }
   0x3   :  { %19 = vsyncpa [#allocation14], 0 }
   0x4   :  { %20 = vsyncpa [#allocation6], 0 }
   0x5   :  { %21 = vsyncpa [#allocation17], 0  ;;  %s2001_s13 = smov [#allocation7]   ;;  %s2002_s15 = smov [#allocation10]  }
   0x6   :  { %s39_s14 = sshll.u32 %s2001_s13, 4  ;;  %s63_s16 = sshll.u32 %s2002_s15, 4  ;;  %s40_s14 = int_to_ptr.vmem [resolvable:$true] %s39_s14  ;;  %s64_s16 = int_to_ptr.vmem [resolvable:$true] %s63_s16 }
   0x7   :  { %s1817_s17 = scalar_lea.vmem %s40_s14, 256  ;;  %p1822_p1 = scmp.lt.s32.totalorder %s40_s14, %s40_s14 }
   0x8   :  { %p1818_p0 = scmp.ne.s32.totalorder %s40_s14, %s1817_s17  ;;  %p1823_p2 = scmp.lt.s32.totalorder %s1817_s17, %s1817_s17 }
   0xa   :  { %p1824_p3 = por %p1823_p2, %p1822_p1 }
   0xc   :  { %p1825_p4 = pnand %p1824_p3, %p1818_p0 }
   0xe   :  { %1828 = shalt.err (!%p1825_p4)
}
   0xf   :  { %s2003_s18 = smov 128   ;;  %s2004_s19 = smov 8  }
  0x10   :  { %45 = dma.hbm_to_vmem [thread:$0]  %s2492_s1, 256, %s40_s14, [#allocation8], %s2003_s18, %s2003_s18, %s2004_s19  }
  0x11   :  { %s1837_s22 = scalar_lea.vmem %s64_s16, 192  ;;  %p1842_p6 = scmp.lt.s32.totalorder %s64_s16, %s64_s16 }
  0x12   :  { %p1838_p5 = scmp.ne.s32.totalorder %s64_s16, %s1837_s22  ;;  %p1843_p7 = scmp.lt.s32.totalorder %s1837_s22, %s1837_s22 }
  0x14   :  { %p1844_p8 = por %p1843_p7, %p1842_p6 }
  0x16   :  { %p1845_p9 = pnand %p1844_p8, %p1838_p5 }
  0x18   :  { %1848 = shalt.err (!%p1845_p9)
}
  0x19   :  { %s2005_s23 = smov 64   ;;  %s2006_s24 = smov 4  }
  0x1a   :  { %69 = dma.hbm_to_vmem [thread:$0]  %s2494_s3, 192, %s64_s16, [#allocation11], %s2005_s23, %s2005_s23, %s2006_s24  }
  0x1b   :  { %s2007_s27 = smov [#allocation4]   ;;  %s2008_s29 = smov [#allocation9]  }
  0x1c   :  { %s27_s28 = sshll.u32 %s2007_s27, 4  ;;  %s51_s1 = sshll.u32 %s2008_s29, 4  ;;  %s28_s28 = int_to_ptr.vmem [resolvable:$true] %s27_s28  ;;  %s52_s1 = int_to_ptr.vmem [resolvable:$true] %s51_s1 }
  0x1d   :  { %s1857_s30 = scalar_lea.vmem %s28_s28, 2048  ;;  %p1862_p11 = scmp.lt.s32.totalorder %s28_s28, %s28_s28 }
  0x1e   :  { %p1858_p10 = scmp.ne.s32.totalorder %s28_s28, %s1857_s30  ;;  %p1863_p12 = scmp.lt.s32.totalorder %s1857_s30, %s1857_s30 }
  0x20   :  { %p1864_p13 = por %p1863_p12, %p1862_p11 }
  0x22   :  { %p1865_p0 = pnand %p1864_p13, %p1858_p10 }
  0x24   :  { %1868 = shalt.err (!%p1865_p0)
}
  0x25   :  { %33 = dma.hbm_to_vmem [thread:$0]  %s2491_s0, 2048, %s28_s28, [#allocation5], %s2003_s18, %s2003_s18, %s2004_s19  }
  0x26   :  { %s1877_s3 = scalar_lea.vmem %s52_s1, 256  ;;  %p1882_p2 = scmp.lt.s32.totalorder %s52_s1, %s52_s1 }
  0x27   :  { %p1878_p1 = scmp.ne.s32.totalorder %s52_s1, %s1877_s3  ;;  %p1883_p3 = scmp.lt.s32.totalorder %s1877_s3, %s1877_s3 }
  0x29   :  { %p1884_p4 = por %p1883_p3, %p1882_p2 }
  0x2b   :  { %p1885_p5 = pnand %p1884_p4, %p1878_p1 }
  0x2d   :  { %1888 = shalt.err (!%p1885_p5)
}
  0x2e   :  { %57 = dma.hbm_to_vmem [thread:$0]  %s2493_s2, 256, %s52_s1, [#allocation8], %s2003_s18, %s2003_s18, %s2004_s19  }
  0x2f   :  { %s2009_s15 = smov [#allocation12]   ;;  %s2010_s17 = smov [#allocation13]  }
  0x30   :  { %s75_s16 = sshll.u32 %s2009_s15, 4  ;;  %s89_s20 = sshll.u32 %s2010_s17, 4  ;;  %s76_s16 = int_to_ptr.vmem [resolvable:$true] %s75_s16  ;;  %s90_s20 = int_to_ptr.vmem [resolvable:$true] %s89_s20 }
  0x31   :  { %s1897_s0 = scalar_lea.vmem %s76_s16, 256  ;;  %p1902_p7 = scmp.lt.s32.totalorder %s76_s16, %s76_s16 }
  0x32   :  { %p1898_p6 = scmp.ne.s32.totalorder %s76_s16, %s1897_s0  ;;  %p1903_p8 = scmp.lt.s32.totalorder %s1897_s0, %s1897_s0 }
  0x34   :  { %p1904_p9 = por %p1903_p8, %p1902_p7 }
  0x36   :  { %p1905_p10 = pnand %p1904_p9, %p1898_p6 }
  0x38   :  { %1908 = shalt.err (!%p1905_p10)
}
  0x39   :  { %81 = dma.hbm_to_vmem [thread:$0]  %s2495_s4, 256, %s76_s16, [#allocation11], %s2005_s23, %s2005_s23, %s2006_s24  }
  0x3a   :  { %s1917_s2 = scalar_lea.vmem %s90_s20, 256  ;;  %p1922_p12 = scmp.lt.s32.totalorder %s90_s20, %s90_s20 }
  0x3b   :  { %p1918_p11 = scmp.ne.s32.totalorder %s90_s20, %s1917_s2  ;;  %p1923_p13 = scmp.lt.s32.totalorder %s1917_s2, %s1917_s2 }
  0x3d   :  { %p1924_p0 = por %p1923_p13, %p1922_p12 }
  0x3f   :  { %p1925_p1 = pnand %p1924_p0, %p1918_p11 }
  0x41   :  { %1928 = shalt.err (!%p1925_p1)
}
  0x42   :  { %95 = dma.hbm_to_vmem [thread:$0]  %s2497_s6, 256, %s90_s20, [#allocation14], %s2005_s23, %s2005_s23, %s2006_s24  }
  0x43   :  { %1989 = dma.done.wait [#allocation5], 2048  }
  0x44   :  { %1990 = vsyncadd [#allocation5], 4294965248 }
  0x45   :  { %1991 = dma.done.wait [#allocation8], 512  }
  0x46   :  { %1992 = vsyncadd [#allocation8], 4294966784 }
  0x47   :  { %1993 = dma.done.wait [#allocation11], 448  }
  0x48   :  { %1994 = vsyncadd [#allocation11], 4294966848 }
  0x49   :  { %1995 = dma.done.wait [#allocation14], 256  }
  0x4a   :  { %1996 = vsyncadd [#allocation14], 4294967040  ;;  %vm185_vm0 = vcmask 1043456   ;;  %v1731_v0 = vld [vmem:[#allocation10 + $0x8] ss:$0 sps:$4 sm:$0xff]   ;;  %v1732_v1 = vld [vmem:[#allocation10] sm:$0xff]   ;;  %v302_v31 = vlaneseq }
  0x4b   :  { %v125_v2 = vld [vmem:[#allocation4 + $0x40] sm:$0xff]  ;;  %1712 = vmatprep.subr.msk.bf16.mxu1 %vm185_vm0, %v1731_v0  ;;  %v187_v3 = vsel %vm185_vm0, %v1731_v0, 0  ;;  %1711 = vmatprep.subr.msk.bf16.mxu0 %vm185_vm0, %v1731_v0  ;;  %v126_v4 = vld [vmem:[#allocation4 + $0x48] sm:$0xff]  ;;  %vm160_vm1 = vcmask 195584   ;;  %v127_v5 = vld [vmem:[#allocation4 + $0x50] sm:$0xff]  ;;  %v2011_v19 = vmov 0.0  }
  0x4c   :  { %1709 = vmatpush3.bf16.msra.mxu1 %v187_v3  ;;  %v137_v6 = vpack.c.bf16 %v126_v4, %v125_v2  ;;  %1604 = vmatpush3.bf16.msra.mxu0 %v187_v3  ;;  %v128_v7 = vld [vmem:[#allocation4 + $0x58] sm:$0xff]  ;;  %v117_v8 = vld [vmem:[#allocation4] sm:$0xff]  ;;  %v118_v9 = vld [vmem:[#allocation4 + $0x8] sm:$0xff]  ;;  %s2012_s4 = smov 32   ;;  %vm2013_vm2 = vmmov 0   ;;  %vm332_vm3 = vcmask 261120  }
  0x4d   :  { %1708 = vmatprep.subr.bf16.mxu1 %v1732_v1  ;;  %1605 = vmatprep.subr.bf16.mxu0 %v1732_v1  ;;  %v119_v10 = vld [vmem:[#allocation4 + $0x10] sm:$0xff]  ;;  %v133_v11 = vpack.c.bf16 %v118_v9, %v117_v8  ;;  %v120_v12 = vld [vmem:[#allocation4 + $0x18] sm:$0xff]  ;;  %v129_v13 = vld [vmem:[#allocation4 + $0x60] sm:$0xff]  ;;  %v138_v15 = vpack.c.bf16 %v128_v7, %v127_v5  ;;  %v303_v35 = vand.u32 127, %v302_v31  ;;  %v2014_v46 = vmov 0.5  }
  0x4e   :  { %1615 = vmatprep.mubr.msk.bf16.mxu1 %vm160_vm1, %v137_v6  ;;  %v130_v14 = vld [vmem:[#allocation4 + $0x68] sm:$0xff]  ;;  %v134_v16 = vpack.c.bf16 %v120_v12, %v119_v10  ;;  %v2111_v17 = vld [vmem:[#allocation12 + $0x8] sm:$0xff]   ;;  %v313_v26 = vld [vmem:[#allocation7] sm:$0xff]  ;;  %vm441_vm7 = vcmask 257024  }
  0x4f   :  { %v139_v18 = vpack.c.bf16 %v130_v14, %v129_v13  ;;  %1607 = vmatprep.mubr.msk.bf16.mxu0 %vm160_vm1, %v133_v11  ;;  %v316_v20 = vld [vmem:[#allocation9] sm:$0xff]  ;;  %v317_v21 = vld [vmem:[#allocation9 + $0x8] sm:$0xff]  ;;  %v314_v27 = vld [vmem:[#allocation7 + $0x8] sm:$0xff]  ;;  %vm304_vm4 = vcmp.ge.s32.totalorder %v303_v35, 64  ;;  %vm305_vm5 = vcmp.lt.s32.totalorder %v303_v35, 96 }
  0x50   :  { %1710 = vmatpush3.bf16.msra.mxu1 %v1732_v1  ;;  %1606 = vmatpush3.bf16.msra.mxu0 %v1732_v1  ;;  %v131_v22 = vld [vmem:[#allocation4 + $0x70] sm:$0xff]  ;;  %v132_v23 = vld [vmem:[#allocation4 + $0x78] sm:$0xff]  ;;  %v315_v28 = vpack.c.bf16 %v314_v27, %v313_v26  ;;  %vm2159_vm6 = vmand %vm304_vm4, %vm305_vm5 }
  0x51   :  { %1623 = vmatprep.subr.bf16.mxu1 %v2011_v19  ;;  %389 = vrot.lane.b32.xlu1 %v316_v20, %s2012_s4  ;;  %v2121_v24 = vld [vmem:[#allocation12] sm:$0xff]   ;;  %v140_v25 = vpack.c.bf16 %v132_v23, %v131_v22  ;;  %v2166_v42 = vld [vmem:[%s2496_s5] ss:$0 sm:$0xff]  ;;  %v2173_v47 = vsel %vm2159_vm6, 1.0, %v2014_v46  ;;  %v2180_v58 = vsel %vm2159_vm6, 0.0, %v2014_v46  ;;  %s2015_s5 = smov 96  }
  0x52   :  { %1655 = vmatprep.subr.bf16.mxu0 %v2011_v19 }
  0x53   :  { %1616 = vmatmul.mubr.msk.bf16.vlgmr.msra.gmra.mxu1 %vm160_vm1, %v138_v15  ;;  %1608 = vmatmul.mubr.msk.bf16.vlgmr.msra.gmra.mxu0 %vm160_vm1, %v134_v16 }
  0x54   :  { %1624 = vmatpush3.bf16.msra.mxu1 %v2111_v17  ;;  %1619 = vmatprep.mubr.msk.bf16.mxu1 %vm160_vm1, %v139_v18 }
  0x55   :  { %1625 = vmatprep.subr.bf16.mxu1 %v2011_v19  ;;  %1656 = vmatpush3.bf16.msra.mxu0 %v2111_v17 }
  0x56   :  { %391 = vrot.lane.b32.xlu1 %v317_v21, %s2012_s4  ;;  %1657 = vmatprep.subr.bf16.mxu0 %v2011_v19 }
  0x58   :  { %1626 = vmatpush3.bf16.msra.mxu1 %v2121_v24 }
  0x59   :  { %1631 = vmatprep.subr.bf16.mxu1 %v2011_v19  ;;  %1658 = vmatpush3.bf16.msra.mxu0 %v2121_v24 }
  0x5a   :  { %1671 = vmatprep.subr.bf16.mxu0 %v2011_v19 }
  0x5b   :  { %1620 = vmatmul.mubr.msk.bf16.gmra.mxu1 %vm160_vm1, %v140_v25 }
  0x5c   :  { %1627 = vmatprep.mubr.msk.bf16.mxu1 %vm2013_vm2, %v2011_v19 }
  0x63   :  { %1628 = vmatmul.mubr.msk.bf16.vlgmr.msra.gmra.mxu1 %vm332_vm3, %v315_v28 }
  0x64   :  { %1632 = vmatpush3.bf16.msra.mxu1 %v2111_v17  ;;  %1635 = vmatprep.mubr.msk.bf16.mxu1 %vm2013_vm2, %v2011_v19 }
  0x65   :  { %1633 = vmatprep.subr.bf16.mxu1 %v2011_v19 }
  0x68   :  { %1634 = vmatpush3.bf16.msra.mxu1 %v2121_v24 }
  0x69   :  { %1639 = vmatprep.subr.bf16.mxu1 %v2011_v19 }
  0xc3   :  { %v390_v4 = vpop.permute.xlu1 %389 }
  0xc8   :  { %v392_v6 = vpop.permute.xlu1 %391 }
 0x113   :  { %v2141_v29 = vpop.f32.mrf.mxu1  ;;  %v2147_v33 = vpop.f32.mrf.mxu0 }
 0x114   :  { %v232_v22 = vadd.f32 %v2147_v33, %v2166_v42 }
 0x115   :  { %v2143_v30 = vpop.f32.mrf.mxu1  ;;  %v223_v37 = vpop.f32.mrf.mxu0 }
 0x116   :  { %v224_v44 = vadd.f32 %v2166_v42, %v223_v37 }
 0x117   :  { %v2145_v32 = vpop.f32.mrf.mxu1  ;;  %v2155_v39 = vpop.f32.mrf.mxu0 }
 0x118   :  { %v235_v27 = vadd.f32 %v2155_v39, %v2166_v42 }
 0x119   :  { %v2149_v34 = vpop.f32.mrf.mxu1  ;;  %v226_v45 = vpop.f32.mrf.mxu0 }
 0x11a   :  { %v227_v51 = vadd.f32 %v2166_v42, %v226_v45 }
 0x11b   :  { %v2151_v36 = vpop.f32.mrf.mxu1 }
 0x11d   :  { %v2153_v38 = vpop.f32.mrf.mxu1 }
 0x11f   :  { %v2157_v40 = vpop.f32.mrf.mxu1 }
 0x121   :  { %v2168_v43 = vpop.f32.mrf.mxu1 }
 0x123   :  { %v370_v48 = vpop.f32.mrf.mxu1 }
 0x124   :  { %v377_v49 = vadd.f32 %v370_v48, %v224_v44 }
 0x125   :  { %v1629_v50 = vpop.f32.mrf.mxu1 }
 0x126   :  { %v379_v52 = vmul.f32 %v377_v49, %v2173_v47 }
 0x127   :  { %v373_v53 = vpop.f32.mrf.mxu1 }
 0x128   :  { %1745 = vtanh.f32 %v379_v52  ;;  %v378_v54 = vadd.f32 %v373_v53, %v227_v51 }
 0x129   :  { %v1630_v55 = vpop.f32.mrf.mxu1 }
 0x12a   :  { %v380_v56 = vmul.f32 %v378_v54, %v2173_v47 }
 0x12c   :  { %1747 = vtanh.f32 %v380_v56 }
 0x135   :  { %v1746_v57 = vpop.eup %1745 }
 0x136   :  { %v383_v59 = vmul.f32 %v1746_v57, %v2173_v47 }
 0x138   :  { %v385_v60 = vadd.f32 %v383_v59, %v2180_v58 }
 0x139   :  { %v1748_v61 = vpop.eup %1747 }
 0x13a   :  { %399 = vrot.lane.b32.xlu0 %v385_v60, %s2005_s23  ;;  %v384_v62 = vmul.f32 %v1748_v61, %v2173_v47  ;;  %v395_v5 = vmul.f32 %v390_v4, %v385_v60  ;;  %v122_v61 = vld [vmem:[#allocation4 + $0x28] sm:$0xff] }
 0x13c   :  { %v386_v63 = vadd.f32 %v384_v62, %v2180_v58  ;;  %v123_v62 = vld [vmem:[#allocation4 + $0x30] sm:$0xff] }
 0x13e   :  { %401 = vrot.lane.b32.xlu0 %v386_v63, %s2005_s23  ;;  %v396_v9 = vmul.f32 %v392_v6, %v386_v63 }
 0x1ac   :  { %v400_v0 = vpop.permute.xlu0 %399 }
 0x1ad   :  { %v405_v1 = vmul.f32 %v400_v0, %v385_v60  ;;  %v124_v0 = vld [vmem:[#allocation4 + $0x38] sm:$0xff] }
 0x1af   :  { %409 = vrot.lane.b32.xlu0 %v405_v1, %s2012_s4  ;;  %v136_v1 = vpack.c.bf16 %v124_v0, %v123_v62 }
 0x1b0   :  { %v402_v2 = vpop.permute.xlu0 %401 }
 0x1b1   :  { %v406_v3 = vmul.f32 %v402_v2, %v386_v63 }
 0x1b3   :  { %411 = vrot.lane.b32.xlu1 %v406_v3, %s2012_s4 }
 0x221   :  { %v410_v7 = vpop.permute.xlu0 %409 }
 0x222   :  { %v415_v8 = vadd.f32 %v410_v7, %v395_v5 }
 0x224   :  { %1749 = vtanh.f32 %v415_v8 }
 0x225   :  { %v412_v10 = vpop.permute.xlu1 %411 }
 0x226   :  { %v416_v11 = vadd.f32 %v412_v10, %v396_v9 }
 0x228   :  { %1751 = vtanh.f32 %v416_v11 }
 0x231   :  { %v1750_v12 = vpop.eup %1749 }
 0x232   :  { %421 = vrot.lane.b32.xlu0 %v1750_v12, %s2005_s23 }
 0x235   :  { %v1752_v13 = vpop.eup %1751 }
 0x236   :  { %423 = vrot.lane.b32.xlu1 %v1752_v13, %s2005_s23 }
 0x2a4   :  { %v422_v14 = vpop.permute.xlu0 %421 }
 0x2a5   :  { %v2192_v16 = vmul.f32 %v422_v14, %v385_v60  ;;  %v121_v60 = vld [vmem:[#allocation4 + $0x20] sm:$0xff] }
 0x2a8   :  { %v424_v15 = vpop.permute.xlu1 %423 }
 0x2a9   :  { %v2194_v18 = vmul.f32 %v424_v15, %v386_v63  ;;  %v135_v63 = vpack.c.bf16 %v122_v61, %v121_v60 }
 0x2ab   :  { %v429_v20 = vpack.c.bf16 %v2194_v18, %v2192_v16  ;;  %1611 = vmatprep.mubr.msk.bf16.mxu0 %vm160_vm1, %v135_v63 }
 0x2ac   :  { %1612 = vmatmul.mubr.msk.bf16.gmra.mxu0 %vm160_vm1, %v136_v1 }
 0x2ad   :  { %447 = vrot.lane.b32.xlu0 %v429_v20, %s2012_s4  ;;  %1659 = vmatprep.mubr.msk.bf16.mxu0 %vm2013_vm2, %v2011_v19 }
 0x31f   :  { %v448_v21 = vpop.permute.xlu0 %447 }
 0x320   :  { %1636 = vmatmul.mubr.msk.bf16.vlgmr.msra.gmra.mxu1 %vm332_vm3, %v448_v21 }
 0x321   :  { %1640 = vmatpush3.bf16.msra.mxu1 %v2111_v17  ;;  %1643 = vmatprep.mubr.msk.bf16.mxu1 %vm2013_vm2, %v2011_v19 }
 0x322   :  { %1641 = vmatprep.subr.bf16.mxu1 %v2011_v19 }
 0x325   :  { %1642 = vmatpush3.bf16.msra.mxu1 %v2121_v24 }
 0x326   :  { %1647 = vmatprep.subr.bf16.mxu1 %v2011_v19 }
 0x36c   :  { %v1613_v10 = vpop.f32.mrf.mxu0 }
 0x36d   :  { %v248_v0 = vadd.f32 %v1613_v10, %v2166_v42 }
 0x3e0   :  { %v486_v23 = vpop.f32.mrf.mxu1 }
 0x3e1   :  { %v493_v25 = vadd.f32 %v486_v23, %v232_v22 }
 0x3e2   :  { %v1637_v26 = vpop.f32.mrf.mxu1 }
 0x3e3   :  { %v495_v28 = vmul.f32 %v493_v25, %v2173_v47 }
 0x3e4   :  { %v489_v31 = vpop.f32.mrf.mxu1 }
 0x3e5   :  { %1753 = vtanh.f32 %v495_v28  ;;  %v494_v35 = vadd.f32 %v489_v31, %v235_v27 }
 0x3e6   :  { %v1638_v37 = vpop.f32.mrf.mxu1 }
 0x3e7   :  { %v496_v41 = vmul.f32 %v494_v35, %v2173_v47 }
 0x3e9   :  { %1755 = vtanh.f32 %v496_v41 }
 0x3f2   :  { %v1754_v44 = vpop.eup %1753 }
 0x3f3   :  { %v499_v45 = vmul.f32 %v1754_v44, %v2173_v47 }
 0x3f5   :  { %v501_v33 = vadd.f32 %v499_v45, %v2180_v58 }
 0x3f6   :  { %v1756_v46 = vpop.eup %1755 }
 0x3f7   :  { %507 = vrot.lane.b32.xlu1 %v501_v33, %s2005_s23  ;;  %v500_v48 = vmul.f32 %v1756_v46, %v2173_v47  ;;  %v503_v53 = vmul.f32 %v501_v33, %v415_v8 }
 0x3f9   :  { %v502_v39 = vadd.f32 %v500_v48, %v2180_v58 }
 0x3fb   :  { %509 = vrot.lane.b32.xlu0 %v502_v39, %s2005_s23  ;;  %v504_v56 = vmul.f32 %v502_v39, %v416_v11  ;;  %v239_v11 = vpop.f32.mrf.mxu0 }
 0x3fc   :  { %v240_v13 = vadd.f32 %v2166_v42, %v239_v11 }
 0x3fd   :  { %v1614_v12 = vpop.f32.mrf.mxu0 }
 0x3ff   :  { %v242_v14 = vpop.f32.mrf.mxu0 }
 0x400   :  { %v243_v22 = vadd.f32 %v2166_v42, %v242_v14 }
 0x469   :  { %v508_v49 = vpop.permute.xlu1 %507 }
 0x46a   :  { %v513_v50 = vmul.f32 %v508_v49, %v501_v33 }
 0x46c   :  { %517 = vrot.lane.b32.xlu1 %v513_v50, %s2012_s4 }
 0x46d   :  { %v510_v51 = vpop.permute.xlu0 %509 }
 0x46e   :  { %v514_v52 = vmul.f32 %v510_v51, %v502_v39 }
 0x470   :  { %519 = vrot.lane.b32.xlu0 %v514_v52, %s2012_s4 }
 0x4de   :  { %v518_v54 = vpop.permute.xlu1 %517 }
 0x4df   :  { %v523_v55 = vadd.f32 %v518_v54, %v503_v53 }
 0x4e1   :  { %1757 = vtanh.f32 %v523_v55 }
 0x4e2   :  { %v520_v57 = vpop.permute.xlu0 %519 }
 0x4e3   :  { %v524_v59 = vadd.f32 %v520_v57, %v504_v56 }
 0x4e5   :  { %1759 = vtanh.f32 %v524_v59 }
 0x4ee   :  { %v1758_v2 = vpop.eup %1757 }
 0x4ef   :  { %529 = vrot.lane.b32.xlu1 %v1758_v2, %s2005_s23 }
 0x4f2   :  { %v1760_v3 = vpop.eup %1759 }
 0x4f3   :  { %531 = vrot.lane.b32.xlu0 %v1760_v3, %s2005_s23 }
 0x561   :  { %v530_v4 = vpop.permute.xlu1 %529 }
 0x562   :  { %v2226_v6 = vmul.f32 %v530_v4, %v501_v33  ;;  %v251_v4 = vadd.f32 %v1614_v12, %v2166_v42 }
 0x565   :  { %v532_v5 = vpop.permute.xlu0 %531 }
 0x566   :  { %v2228_v7 = vmul.f32 %v532_v5, %v502_v39 }
 0x568   :  { %v537_v8 = vpack.c.bf16 %v2228_v7, %v2226_v6 }
 0x56a   :  { %555 = vrot.lane.b32.xlu1 %v537_v8, %s2012_s4 }
 0x5dc   :  { %v556_v9 = vpop.permute.xlu1 %555 }
 0x5dd   :  { %1644 = vmatmul.mubr.msk.bf16.vlgmr.msra.gmra.mxu1 %vm332_vm3, %v556_v9 }
 0x5de   :  { %1648 = vmatpush3.bf16.msra.mxu1 %v2111_v17  ;;  %1651 = vmatprep.mubr.msk.bf16.mxu1 %vm2013_vm2, %v2011_v19 }
 0x5df   :  { %1649 = vmatprep.subr.bf16.mxu1 %v2011_v19 }
 0x5e2   :  { %1650 = vmatpush3.bf16.msra.mxu1 %v2121_v24 }
 0x5e3   :  { %1663 = vmatprep.subr.bf16.mxu1 %v2011_v19 }
 0x69d   :  { %v594_v15 = vpop.f32.mrf.mxu1 }
 0x69e   :  { %v601_v20 = vadd.f32 %v594_v15, %v240_v13 }
 0x69f   :  { %v1645_v21 = vpop.f32.mrf.mxu1 }
 0x6a0   :  { %v603_v23 = vmul.f32 %v601_v20, %v2173_v47 }
 0x6a1   :  { %v597_v25 = vpop.f32.mrf.mxu1 }
 0x6a2   :  { %1761 = vtanh.f32 %v603_v23  ;;  %v602_v26 = vadd.f32 %v597_v25, %v243_v22 }
 0x6a3   :  { %v1646_v27 = vpop.f32.mrf.mxu1 }
 0x6a4   :  { %v604_v28 = vmul.f32 %v602_v26, %v2173_v47 }
 0x6a6   :  { %1763 = vtanh.f32 %v604_v28 }
 0x6af   :  { %v1762_v31 = vpop.eup %1761 }
 0x6b0   :  { %v607_v35 = vmul.f32 %v1762_v31, %v2173_v47 }
 0x6b2   :  { %v609_v37 = vadd.f32 %v607_v35, %v2180_v58 }
 0x6b3   :  { %v1764_v41 = vpop.eup %1763 }
 0x6b4   :  { %615 = vrot.lane.b32.xlu0 %v609_v37, %s2005_s23  ;;  %v608_v44 = vmul.f32 %v1764_v41, %v2173_v47  ;;  %v611_v49 = vmul.f32 %v609_v37, %v523_v55 }
 0x6b6   :  { %v610_v45 = vadd.f32 %v608_v44, %v2180_v58 }
 0x6b8   :  { %617 = vrot.lane.b32.xlu1 %v610_v45, %s2005_s23  ;;  %v612_v52 = vmul.f32 %v610_v45, %v524_v59 }
 0x726   :  { %v616_v33 = vpop.permute.xlu0 %615 }
 0x727   :  { %v621_v46 = vmul.f32 %v616_v33, %v609_v37 }
 0x729   :  { %625 = vrot.lane.b32.xlu0 %v621_v46, %s2012_s4 }
 0x72a   :  { %v618_v48 = vpop.permute.xlu1 %617 }
 0x72b   :  { %v622_v39 = vmul.f32 %v618_v48, %v610_v45 }
 0x72d   :  { %627 = vrot.lane.b32.xlu1 %v622_v39, %s2012_s4 }
 0x79b   :  { %v626_v50 = vpop.permute.xlu0 %625 }
 0x79c   :  { %v631_v51 = vadd.f32 %v626_v50, %v611_v49 }
 0x79e   :  { %1765 = vtanh.f32 %v631_v51 }
 0x79f   :  { %v628_v53 = vpop.permute.xlu1 %627 }
 0x7a0   :  { %v632_v54 = vadd.f32 %v628_v53, %v612_v52 }
 0x7a2   :  { %1767 = vtanh.f32 %v632_v54 }
 0x7ab   :  { %v1766_v56 = vpop.eup %1765 }
 0x7ac   :  { %637 = vrot.lane.b32.xlu0 %v1766_v56, %s2005_s23  ;;  %v259_v56 = vadd.f32 %v2166_v42, %v2149_v34 }
 0x7af   :  { %v1768_v57 = vpop.eup %1767 }
 0x7b0   :  { %639 = vrot.lane.b32.xlu1 %v1768_v57, %s2005_s23 }
 0x81e   :  { %v638_v60 = vpop.permute.xlu0 %637 }
 0x81f   :  { %v2254_v62 = vmul.f32 %v638_v60, %v609_v37 }
 0x822   :  { %v640_v61 = vpop.permute.xlu1 %639 }
 0x823   :  { %v2256_v63 = vmul.f32 %v640_v61, %v610_v45 }
 0x825   :  { %v645_v55 = vpack.c.bf16 %v2256_v63, %v2254_v62 }
 0x827   :  { %663 = vrot.lane.b32.xlu0 %v645_v55, %s2012_s4 }
 0x899   :  { %v664_v59 = vpop.permute.xlu0 %663 }
 0x89a   :  { %1652 = vmatmul.mubr.msk.bf16.vlgmr.msra.gmra.mxu1 %vm332_vm3, %v664_v59 }
 0x89b   :  { %1664 = vmatpush3.bf16.msra.mxu1 %v2111_v17  ;;  %1667 = vmatprep.mubr.msk.bf16.mxu1 %vm2013_vm2, %v2011_v19 }
 0x89c   :  { %1665 = vmatprep.subr.bf16.mxu1 %v2011_v19 }
 0x89f   :  { %1666 = vmatpush3.bf16.msra.mxu1 %v2121_v24 }
 0x8a0   :  { %1679 = vmatprep.subr.bf16.mxu1 %v2011_v19 }
 0x95a   :  { %v702_v1 = vpop.f32.mrf.mxu1 }
 0x95b   :  { %v709_v2 = vadd.f32 %v702_v1, %v248_v0 }
 0x95c   :  { %v1653_v3 = vpop.f32.mrf.mxu1 }
 0x95d   :  { %v711_v5 = vmul.f32 %v709_v2, %v2173_v47 }
 0x95e   :  { %v705_v8 = vpop.f32.mrf.mxu1 }
 0x95f   :  { %1769 = vtanh.f32 %v711_v5  ;;  %v710_v9 = vadd.f32 %v705_v8, %v251_v4 }
 0x960   :  { %v1654_v11 = vpop.f32.mrf.mxu1 }
 0x961   :  { %v712_v13 = vmul.f32 %v710_v9, %v2173_v47 }
 0x963   :  { %1771 = vtanh.f32 %v712_v13 }
 0x96c   :  { %v1770_v14 = vpop.eup %1769 }
 0x96d   :  { %v715_v15 = vmul.f32 %v1770_v14, %v2173_v47 }
 0x96f   :  { %v717_v20 = vadd.f32 %v715_v15, %v2180_v58 }
 0x970   :  { %v1772_v10 = vpop.eup %1771 }
 0x971   :  { %723 = vrot.lane.b32.xlu1 %v717_v20, %s2005_s23  ;;  %v716_v21 = vmul.f32 %v1772_v10, %v2173_v47  ;;  %v719_v27 = vmul.f32 %v717_v20, %v631_v51  ;;  %v256_v51 = vadd.f32 %v2166_v42, %v2143_v30 }
 0x973   :  { %v718_v12 = vadd.f32 %v716_v21, %v2180_v58 }
 0x975   :  { %725 = vrot.lane.b32.xlu0 %v718_v12, %s2005_s23  ;;  %v720_v35 = vmul.f32 %v718_v12, %v632_v54 }
 0x9e3   :  { %v724_v22 = vpop.permute.xlu1 %723 }
 0x9e4   :  { %v729_v23 = vmul.f32 %v724_v22, %v717_v20 }
 0x9e6   :  { %733 = vrot.lane.b32.xlu1 %v729_v23, %s2012_s4 }
 0x9e7   :  { %v726_v25 = vpop.permute.xlu0 %725 }
 0x9e8   :  { %v730_v26 = vmul.f32 %v726_v25, %v718_v12 }
 0x9ea   :  { %735 = vrot.lane.b32.xlu0 %v730_v26, %s2012_s4 }
 0xa58   :  { %v734_v28 = vpop.permute.xlu1 %733 }
 0xa59   :  { %v739_v31 = vadd.f32 %v734_v28, %v719_v27 }
 0xa5b   :  { %1773 = vtanh.f32 %v739_v31 }
 0xa5c   :  { %v736_v37 = vpop.permute.xlu0 %735 }
 0xa5d   :  { %v740_v41 = vadd.f32 %v736_v37, %v720_v35 }
 0xa5f   :  { %1775 = vtanh.f32 %v740_v41 }
 0xa68   :  { %v1774_v44 = vpop.eup %1773 }
 0xa69   :  { %745 = vrot.lane.b32.xlu1 %v1774_v44, %s2005_s23  ;;  %v267_v44 = vadd.f32 %v2145_v32, %v2166_v42 }
 0xa6c   :  { %v1776_v45 = vpop.eup %1775 }
 0xa6d   :  { %747 = vrot.lane.b32.xlu0 %v1776_v45, %s2005_s23 }
 0xadb   :  { %v746_v33 = vpop.permute.xlu1 %745 }
 0xadc   :  { %v2282_v48 = vmul.f32 %v746_v33, %v717_v20 }
 0xadf   :  { %v748_v46 = vpop.permute.xlu0 %747 }
 0xae0   :  { %v2284_v39 = vmul.f32 %v748_v46, %v718_v12 }
 0xae2   :  { %v753_v49 = vpack.c.bf16 %v2284_v39, %v2282_v48 }
 0xae4   :  { %771 = vrot.lane.b32.xlu1 %v753_v49, %s2012_s4 }
 0xb56   :  { %v772_v50 = vpop.permute.xlu1 %771 }
 0xb57   :  { %1660 = vmatmul.mubr.msk.bf16.vlgmr.msra.gmra.mxu0 %vm332_vm3, %v772_v50 }
 0xb58   :  { %1672 = vmatpush3.bf16.msra.mxu0 %v2111_v17  ;;  %1675 = vmatprep.mubr.msk.bf16.mxu0 %vm2013_vm2, %v2011_v19 }
 0xb59   :  { %1673 = vmatprep.subr.bf16.mxu0 %v2011_v19 }
 0xb5c   :  { %1674 = vmatpush3.bf16.msra.mxu0 %v2121_v24 }
 0xc17   :  { %v810_v52 = vpop.f32.mrf.mxu0 }
 0xc18   :  { %v817_v53 = vadd.f32 %v810_v52, %v256_v51 }
 0xc19   :  { %v1661_v54 = vpop.f32.mrf.mxu0 }
 0xc1a   :  { %v819_v57 = vmul.f32 %v817_v53, %v2173_v47 }
 0xc1b   :  { %v813_v60 = vpop.f32.mrf.mxu0 }
 0xc1c   :  { %1777 = vtanh.f32 %v819_v57  ;;  %v818_v61 = vadd.f32 %v813_v60, %v259_v56 }
 0xc1d   :  { %v1662_v55 = vpop.f32.mrf.mxu0 }
 0xc1e   :  { %v820_v59 = vmul.f32 %v818_v61, %v2173_v47 }
 0xc20   :  { %1779 = vtanh.f32 %v820_v59 }
 0xc29   :  { %v1778_v0 = vpop.eup %1777 }
 0xc2a   :  { %v823_v1 = vmul.f32 %v1778_v0, %v2173_v47 }
 0xc2c   :  { %v825_v30 = vadd.f32 %v823_v1, %v2180_v58 }
 0xc2d   :  { %v1780_v2 = vpop.eup %1779 }
 0xc2e   :  { %831 = vrot.lane.b32.xlu0 %v825_v30, %s2005_s23  ;;  %v824_v3 = vmul.f32 %v1780_v2, %v2173_v47  ;;  %v827_v11 = vmul.f32 %v825_v30, %v739_v31  ;;  %v264_v31 = vadd.f32 %v2141_v29, %v2166_v42 }
 0xc30   :  { %v826_v34 = vadd.f32 %v824_v3, %v2180_v58 }
 0xc32   :  { %833 = vrot.lane.b32.xlu1 %v826_v34, %s2005_s23  ;;  %v828_v15 = vmul.f32 %v826_v34, %v740_v41 }
 0xca0   :  { %v832_v4 = vpop.permute.xlu0 %831 }
 0xca1   :  { %v837_v5 = vmul.f32 %v832_v4, %v825_v30 }
 0xca3   :  { %841 = vrot.lane.b32.xlu0 %v837_v5, %s2012_s4 }
 0xca4   :  { %v834_v8 = vpop.permute.xlu1 %833 }
 0xca5   :  { %v838_v9 = vmul.f32 %v834_v8, %v826_v34 }
 0xca7   :  { %843 = vrot.lane.b32.xlu1 %v838_v9, %s2012_s4  ;;  %v272_v9 = vadd.f32 %v2166_v42, %v2153_v38 }
 0xd15   :  { %v842_v13 = vpop.permute.xlu0 %841 }
 0xd16   :  { %v847_v14 = vadd.f32 %v842_v13, %v827_v11 }
 0xd18   :  { %1781 = vtanh.f32 %v847_v14 }
 0xd19   :  { %v844_v20 = vpop.permute.xlu1 %843 }
 0xd1a   :  { %v848_v10 = vadd.f32 %v844_v20, %v828_v15  ;;  %v275_v15 = vadd.f32 %v2166_v42, %v2168_v43 }
 0xd1c   :  { %1783 = vtanh.f32 %v848_v10 }
 0xd25   :  { %v1782_v21 = vpop.eup %1781 }
 0xd26   :  { %853 = vrot.lane.b32.xlu0 %v1782_v21, %s2005_s23 }
 0xd29   :  { %v1784_v12 = vpop.eup %1783 }
 0xd2a   :  { %855 = vrot.lane.b32.xlu1 %v1784_v12, %s2005_s23 }
 0xd98   :  { %v854_v22 = vpop.permute.xlu0 %853 }
 0xd99   :  { %v2311_v25 = vmul.f32 %v854_v22, %v825_v30 }
 0xd9c   :  { %v856_v23 = vpop.permute.xlu1 %855 }
 0xd9d   :  { %v2313_v26 = vmul.f32 %v856_v23, %v826_v34 }
 0xd9f   :  { %v861_v27 = vpack.c.bf16 %v2313_v26, %v2311_v25 }
 0xda1   :  { %879 = vrot.lane.b32.xlu0 %v861_v27, %s2012_s4 }
 0xe13   :  { %v880_v28 = vpop.permute.xlu0 %879 }
 0xe14   :  { %1668 = vmatmul.mubr.msk.bf16.vlgmr.msra.gmra.mxu1 %vm332_vm3, %v880_v28 }
 0xe15   :  { %1680 = vmatpush3.bf16.msra.mxu1 %v2111_v17  ;;  %1683 = vmatprep.mubr.msk.bf16.mxu1 %vm2013_vm2, %v2011_v19 }
 0xe16   :  { %1681 = vmatprep.subr.bf16.mxu1 %v2011_v19 }
 0xe19   :  { %1682 = vmatpush3.bf16.msra.mxu1 %v2121_v24 }
 0xed4   :  { %v918_v35 = vpop.f32.mrf.mxu1 }
 0xed5   :  { %v925_v37 = vadd.f32 %v918_v35, %v264_v31 }
 0xed6   :  { %v1669_v41 = vpop.f32.mrf.mxu1 }
 0xed7   :  { %v927_v45 = vmul.f32 %v925_v37, %v2173_v47 }
 0xed8   :  { %v921_v33 = vpop.f32.mrf.mxu1 }
 0xed9   :  { %1785 = vtanh.f32 %v927_v45  ;;  %v926_v17 = vadd.f32 %v921_v33, %v267_v44 }
 0xeda   :  { %v1670_v46 = vpop.f32.mrf.mxu1 }
 0xedb   :  { %v928_v49 = vmul.f32 %v926_v17, %v2173_v47 }
 0xedd   :  { %1787 = vtanh.f32 %v928_v49 }
 0xee6   :  { %v1786_v19 = vpop.eup %1785 }
 0xee7   :  { %v931_v24 = vmul.f32 %v1786_v19, %v2173_v47 }
 0xee9   :  { %v933_v29 = vadd.f32 %v931_v24, %v2180_v58 }
 0xeea   :  { %v1788_v50 = vpop.eup %1787 }
 0xeeb   :  { %939 = vrot.lane.b32.xlu1 %v933_v29, %s2005_s23  ;;  %v932_v51 = vmul.f32 %v1788_v50, %v2173_v47  ;;  %v935_v57 = vmul.f32 %v933_v29, %v847_v14 }
 0xeed   :  { %v934_v32 = vadd.f32 %v932_v51, %v2180_v58 }
 0xeef   :  { %941 = vrot.lane.b32.xlu0 %v934_v32, %s2005_s23  ;;  %v936_v55 = vmul.f32 %v934_v32, %v848_v10 }
 0xf5d   :  { %v940_v52 = vpop.permute.xlu1 %939 }
 0xf5e   :  { %v945_v53 = vmul.f32 %v940_v52, %v933_v29 }
 0xf60   :  { %949 = vrot.lane.b32.xlu1 %v945_v53, %s2012_s4 }
 0xf61   :  { %v942_v54 = vpop.permute.xlu0 %941 }
 0xf62   :  { %v946_v56 = vmul.f32 %v942_v54, %v934_v32 }
 0xf64   :  { %951 = vrot.lane.b32.xlu0 %v946_v56, %s2012_s4  ;;  %v280_v56 = vadd.f32 %v2151_v36, %v2166_v42 }
 0xfd2   :  { %v950_v60 = vpop.permute.xlu1 %949 }
 0xfd3   :  { %v955_v61 = vadd.f32 %v950_v60, %v935_v57 }
 0xfd5   :  { %1789 = vtanh.f32 %v955_v61 }
 0xfd6   :  { %v952_v59 = vpop.permute.xlu0 %951 }
 0xfd7   :  { %v956_v0 = vadd.f32 %v952_v59, %v936_v55  ;;  %v283_v55 = vadd.f32 %v2157_v40, %v2166_v42 }
 0xfd9   :  { %1791 = vtanh.f32 %v956_v0 }
 0xfe2   :  { %v1790_v1 = vpop.eup %1789 }
 0xfe3   :  { %961 = vrot.lane.b32.xlu1 %v1790_v1, %s2005_s23 }
 0xfe6   :  { %v1792_v30 = vpop.eup %1791 }
 0xfe7   :  { %963 = vrot.lane.b32.xlu0 %v1792_v30, %s2005_s23 }
0x1055   :  { %v962_v2 = vpop.permute.xlu1 %961 }
0x1056   :  { %v2340_v34 = vmul.f32 %v962_v2, %v933_v29 }
0x1059   :  { %v964_v3 = vpop.permute.xlu0 %963 }
0x105a   :  { %v2342_v4 = vmul.f32 %v964_v3, %v934_v32 }
0x105c   :  { %v969_v5 = vpack.c.bf16 %v2342_v4, %v2340_v34 }
0x105e   :  { %987 = vrot.lane.b32.xlu1 %v969_v5, %s2012_s4 }
0x10d0   :  { %v988_v8 = vpop.permute.xlu1 %987 }
0x10d1   :  { %1676 = vmatmul.mubr.msk.bf16.vlgmr.msra.gmra.mxu0 %vm332_vm3, %v988_v8 }
0x1191   :  { %v1026_v11 = vpop.f32.mrf.mxu0 }
0x1192   :  { %v1033_v13 = vadd.f32 %v1026_v11, %v272_v9 }
0x1193   :  { %v1677_v14 = vpop.f32.mrf.mxu0 }
0x1194   :  { %v1035_v20 = vmul.f32 %v1033_v13, %v2173_v47 }
0x1195   :  { %v1029_v10 = vpop.f32.mrf.mxu0 }
0x1196   :  { %1793 = vtanh.f32 %v1035_v20  ;;  %v1034_v21 = vadd.f32 %v1029_v10, %v275_v15 }
0x1197   :  { %v1678_v12 = vpop.f32.mrf.mxu0 }
0x1198   :  { %v1036_v22 = vmul.f32 %v1034_v21, %v2173_v47 }
0x119a   :  { %1795 = vtanh.f32 %v1036_v22 }
0x11a3   :  { %v1794_v23 = vpop.eup %1793 }
0x11a4   :  { %v1039_v27 = vmul.f32 %v1794_v23, %v2173_v47  ;;  %v1543_v23 = vpack.c.bf16 %v2192_v16, %v2192_v16  ;;  %v1546_v16 = vpack.c.bf16 %v2228_v7, %v2228_v7  ;;  %v1550_v7 = vpack.c.bf16 %v2284_v39, %v2284_v39 }
0x11a5   :  { %v1554_v39 = vpack.c.bf16 %v2342_v4, %v2342_v4 }
0x11a6   :  { %v1041_v38 = vadd.f32 %v1039_v27, %v2180_v58  ;;  %v1736_v27 = vld [vmem:[#allocation13] sm:$0xff]  }
0x11a7   :  { %v1796_v28 = vpop.eup %1795 }
0x11a8   :  { %1047 = vrot.lane.b32.xlu0 %v1041_v38, %s2005_s23  ;;  %v1040_v31 = vmul.f32 %v1796_v28, %v2173_v47  ;;  %v1043_v45 = vmul.f32 %v1041_v38, %v955_v61  ;;  %v1544_v28 = vpack.c.bf16 %v2194_v18, %v2194_v18  ;;  %v1548_v18 = vpack.c.bf16 %v2256_v63, %v2256_v63 }
0x11a9   :  { %v1552_v63 = vpack.c.bf16 %v2313_v26, %v2313_v26 }
0x11aa   :  { %v1042_v43 = vadd.f32 %v1040_v31, %v2180_v58  ;;  %v1545_v31 = vpack.c.bf16 %v2226_v6, %v2226_v6  ;;  %v1549_v6 = vpack.c.bf16 %v2282_v48, %v2282_v48  ;;  %v1553_v48 = vpack.c.bf16 %v2340_v34, %v2340_v34 }
0x11ac   :  { %1049 = vrot.lane.b32.xlu1 %v1042_v43, %s2005_s23  ;;  %v1044_v46 = vmul.f32 %v1042_v43, %v956_v0 }
0x121a   :  { %v1048_v35 = vpop.permute.xlu0 %1047 }
0x121b   :  { %v1053_v37 = vmul.f32 %v1048_v35, %v1041_v38 }
0x121d   :  { %1057 = vrot.lane.b32.xlu0 %v1053_v37, %s2012_s4 }
0x121e   :  { %v1050_v41 = vpop.permute.xlu1 %1049 }
0x121f   :  { %v1054_v44 = vmul.f32 %v1050_v41, %v1042_v43 }
0x1221   :  { %1059 = vrot.lane.b32.xlu1 %v1054_v44, %s2012_s4 }
0x128f   :  { %v1058_v33 = vpop.permute.xlu0 %1057 }
0x1290   :  { %v1063_v17 = vadd.f32 %v1058_v33, %v1043_v45 }
0x1292   :  { %1797 = vtanh.f32 %v1063_v17 }
0x1293   :  { %v1060_v49 = vpop.permute.xlu1 %1059 }
0x1294   :  { %v1064_v19 = vadd.f32 %v1060_v49, %v1044_v46 }
0x1296   :  { %1799 = vtanh.f32 %v1064_v19 }
0x129f   :  { %v1798_v24 = vpop.eup %1797 }
0x12a0   :  { %1069 = vrot.lane.b32.xlu0 %v1798_v24, %s2005_s23 }
0x12a3   :  { %v1800_v29 = vpop.eup %1799 }
0x12a4   :  { %1071 = vrot.lane.b32.xlu1 %v1800_v29, %s2005_s23 }
0x1312   :  { %v1070_v50 = vpop.permute.xlu0 %1069 }
0x1313   :  { %v2364_v32 = vmul.f32 %v1070_v50, %v1041_v38 }
0x1316   :  { %v1072_v51 = vpop.permute.xlu1 %1071 }
0x1317   :  { %v2366_v52 = vmul.f32 %v1072_v51, %v1042_v43  ;;  %v1547_v43 = vpack.c.bf16 %v2254_v62, %v2254_v62  ;;  %v1551_v62 = vpack.c.bf16 %v2311_v25, %v2311_v25  ;;  %v1555_v25 = vpack.c.bf16 %v2364_v32, %v2364_v32 }
0x1319   :  { %v1077_v53 = vpack.c.bf16 %v2366_v52, %v2364_v32  ;;  %v1556_v26 = vpack.c.bf16 %v2366_v52, %v2366_v52 }
0x131b   :  { %1095 = vrot.lane.b32.xlu0 %v1077_v53, %s2012_s4 }
0x138d   :  { %v1096_v54 = vpop.permute.xlu0 %1095 }
0x138e   :  { %1684 = vmatmul.mubr.msk.bf16.vlgmr.msra.gmra.mxu1 %vm332_vm3, %v1096_v54 }
0x144e   :  { %v1134_v57 = vpop.f32.mrf.mxu1 }
0x144f   :  { %v1141_v60 = vadd.f32 %v1134_v57, %v280_v56 }
0x1450   :  { %v1685_v61 = vpop.f32.mrf.mxu1 }
0x1451   :  { %v1143_v59 = vmul.f32 %v1141_v60, %v2173_v47 }
0x1452   :  { %v1137_v0 = vpop.f32.mrf.mxu1 }
0x1453   :  { %1801 = vtanh.f32 %v1143_v59  ;;  %v1142_v1 = vadd.f32 %v1137_v0, %v283_v55 }
0x1454   :  { %v1686_v30 = vpop.f32.mrf.mxu1 }
0x1455   :  { %v1144_v2 = vmul.f32 %v1142_v1, %v2173_v47 }
0x1457   :  { %1803 = vtanh.f32 %v1144_v2 }
0x1460   :  { %v1802_v3 = vpop.eup %1801 }
0x1461   :  { %v1147_v5 = vmul.f32 %v1802_v3, %v2173_v47 }
0x1463   :  { %v1149_v36 = vadd.f32 %v1147_v5, %v2180_v58 }
0x1464   :  { %v1804_v8 = vpop.eup %1803 }
0x1465   :  { %1155 = vrot.lane.b32.xlu1 %v1149_v36, %s2005_s23  ;;  %v1148_v9 = vmul.f32 %v1804_v8, %v2173_v47  ;;  %v1151_v15 = vmul.f32 %v1149_v36, %v1063_v17 }
0x1467   :  { %v1150_v40 = vadd.f32 %v1148_v9, %v2180_v58  ;;  %v1735_v58 = vld [vmem:[#allocation13 + $0x8] sm:$0xff]  }
0x1468   :  { %1687 = vmatprep.subr.bf16.mxu0 %v1735_v58 }
0x1469   :  { %1157 = vrot.lane.b32.xlu0 %v1150_v40, %s2005_s23  ;;  %v1152_v21 = vmul.f32 %v1150_v40, %v1064_v19  ;;  %1688 = vmatpush3.bf16.msra.mxu0 %v1735_v58 }
0x146a   :  { %1689 = vmatprep.subr.bf16.mxu0 %v1736_v27 }
0x146d   :  { %1690 = vmatpush3.bf16.msra.mxu0 %v1736_v27 }
0x14d7   :  { %v1156_v42 = vpop.permute.xlu1 %1155 }
0x14d8   :  { %v1161_v11 = vmul.f32 %v1156_v42, %v1149_v36 }
0x14da   :  { %1165 = vrot.lane.b32.xlu1 %v1161_v11, %s2012_s4 }
0x14db   :  { %v1158_v13 = vpop.permute.xlu0 %1157 }
0x14dc   :  { %v1162_v14 = vmul.f32 %v1158_v13, %v1150_v40 }
0x14de   :  { %1167 = vrot.lane.b32.xlu0 %v1162_v14, %s2012_s4 }
0x154c   :  { %v1166_v20 = vpop.permute.xlu1 %1165 }
0x154d   :  { %v2386_v10 = vadd.f32 %v1166_v20, %v1151_v15 }
0x154f   :  { %1805 = vtanh.f32 %v2386_v10 }
0x1550   :  { %v1168_v47 = vpop.permute.xlu0 %1167 }
0x1551   :  { %v2389_v12 = vadd.f32 %v1168_v47, %v1152_v21 }
0x1553   :  { %1807 = vtanh.f32 %v2389_v12 }
0x155c   :  { %v1806_v22 = vpop.eup %1805 }
0x155d   :  { %1177 = vrot.lane.b32.xlu1 %v1806_v22, %s2005_s23 }
0x1560   :  { %v1808_v38 = vpop.eup %1807 }
0x1561   :  { %435 = vrot.lane.b32.xlu1 %v1543_v23, %s2012_s4  ;;  %1179 = vrot.lane.b32.xlu0 %v1808_v38, %s2005_s23  ;;  %s2016_s23 = smov [#allocation16]  }
0x1562   :  { %s1453_s27 = sshll.u32 %s2016_s23, 4  ;;  %s1454_s27 = int_to_ptr.vmem [resolvable:$true] %s1453_s27 }
0x1563   :  { %s1929_s28 = scalar_lea.vmem %s1454_s27, 256  ;;  %p1934_p3 = scmp.lt.s32.totalorder %s1454_s27, %s1454_s27 }
0x1564   :  { %p1930_p2 = scmp.ne.s32.totalorder %s1454_s27, %s1929_s28  ;;  %p1935_p4 = scmp.lt.s32.totalorder %s1929_s28, %s1929_s28 }
0x1565   :  { %543 = vrot.lane.b32.xlu1 %v1545_v31, %s2012_s4  ;;  %437 = vrot.lane.b32.xlu0 %v1544_v28, %s2012_s4 }
0x1566   :  { %p1936_p5 = por %p1935_p4, %p1934_p3 }
0x1568   :  { %p1937_p6 = pnand %p1936_p5, %p1930_p2 }
0x1569   :  { %651 = vrot.lane.b32.xlu1 %v1547_v43, %s2012_s4  ;;  %545 = vrot.lane.b32.xlu0 %v1546_v16, %s2012_s4 }
0x156d   :  { %759 = vrot.lane.b32.xlu1 %v1549_v6, %s2012_s4  ;;  %653 = vrot.lane.b32.xlu0 %v1548_v18, %s2012_s4 }
0x1571   :  { %867 = vrot.lane.b32.xlu1 %v1551_v62, %s2012_s4  ;;  %761 = vrot.lane.b32.xlu0 %v1550_v7, %s2012_s4 }
0x1575   :  { %975 = vrot.lane.b32.xlu1 %v1553_v48, %s2012_s4  ;;  %869 = vrot.lane.b32.xlu0 %v1552_v63, %s2012_s4 }
0x1579   :  { %1083 = vrot.lane.b32.xlu1 %v1555_v25, %s2012_s4  ;;  %977 = vrot.lane.b32.xlu0 %v1554_v39, %s2012_s4 }
0x157d   :  { %1085 = vrot.lane.b32.xlu0 %v1556_v26, %s2012_s4 }
0x15cf   :  { %v1178_v34 = vpop.permute.xlu1 %1177 }
0x15d0   :  { %v1183_v35 = vmul.f32 %v1178_v34, %v1149_v36 }
0x15d2   :  { %v1557_v37 = vpack.c.bf16 %v1183_v35, %v1183_v35 }
0x15d3   :  { %v436_v41 = vpop.permute.xlu1 %435  ;;  %v1180_v44 = vpop.permute.xlu0 %1179 }
0x15d4   :  { %442 = vst.msk [vmem:[#allocation3] sm:$0xf] %vm441_vm7, %v436_v41  ;;  %v1184_v4 = vmul.f32 %v1180_v44, %v1150_v40  ;;  %1191 = vrot.lane.b32.xlu1 %v1557_v37, %s2012_s4 }
0x15d6   :  { %v1558_v45 = vpack.c.bf16 %v1184_v4, %v1184_v4 }
0x15d7   :  { %v544_v33 = vpop.permute.xlu1 %543  ;;  %v438_v17 = vpop.permute.xlu0 %437 }
0x15d8   :  { %550 = vst.msk [vmem:[#allocation3 + $0x8] sm:$0xf] %vm441_vm7, %v544_v33  ;;  %443 = vst.msk [vmem:[#allocation3 + $0x4] sm:$0xf] %vm441_vm7, %v438_v17  ;;  %1202 = vrot.lane.b32.xlu1 %v1183_v35, %s2012_s4  ;;  %1193 = vrot.lane.b32.xlu0 %v1558_v45, %s2012_s4 }
0x15db   :  { %v652_v46 = vpop.permute.xlu1 %651  ;;  %v546_v49 = vpop.permute.xlu0 %545 }
0x15dc   :  { %658 = vst.msk [vmem:[#allocation3 + $0x10] sm:$0xf] %vm441_vm7, %v652_v46  ;;  %551 = vst.msk [vmem:[#allocation3 + $0xc] sm:$0xf] %vm441_vm7, %v546_v49  ;;  %1212 = vrot.lane.b32.xlu1 %v2386_v10, %s2015_s5  ;;  %1204 = vrot.lane.b32.xlu0 %v1184_v4, %s2012_s4 }
0x15df   :  { %v760_v19 = vpop.permute.xlu1 %759  ;;  %v654_v24 = vpop.permute.xlu0 %653  ;;  %v1737_v29 = vld [vmem:[#allocation3] sm:$0xff]  }
0x15e0   :  { %766 = vst.msk [vmem:[#allocation3 + $0x18] sm:$0xf] %vm441_vm7, %v760_v19  ;;  %659 = vst.msk [vmem:[#allocation3 + $0x14] sm:$0xf] %vm441_vm7, %v654_v24  ;;  %1214 = vrot.lane.b32.xlu0 %v2389_v12, %s2015_s5  ;;  %1691 = vmatprep.mubr.msk.bf16.mxu0 %vm332_vm3, %v1737_v29 }
0x15e3   :  { %v868_v50 = vpop.permute.xlu1 %867  ;;  %v762_v51 = vpop.permute.xlu0 %761  ;;  %v1738_v32 = vld [vmem:[#allocation3 + $0x8] sm:$0xff]  }
0x15e4   :  { %874 = vst.msk [vmem:[#allocation3 + $0x20] sm:$0xf] %vm441_vm7, %v868_v50  ;;  %767 = vst.msk [vmem:[#allocation3 + $0x1c] sm:$0xf] %vm441_vm7, %v762_v51  ;;  %1692 = vmatmul.mubr.msk.bf16.vlgmr.msra.gmra.mxu0 %vm332_vm3, %v1738_v32 }
0x15e7   :  { %v976_v52 = vpop.permute.xlu1 %975  ;;  %v870_v53 = vpop.permute.xlu0 %869  ;;  %v1739_v54 = vld [vmem:[#allocation3 + $0x10] sm:$0xff]  }
0x15e8   :  { %982 = vst.msk [vmem:[#allocation3 + $0x28] sm:$0xf] %vm441_vm7, %v976_v52  ;;  %875 = vst.msk [vmem:[#allocation3 + $0x24] sm:$0xf] %vm441_vm7, %v870_v53  ;;  %1695 = vmatprep.mubr.msk.bf16.mxu0 %vm332_vm3, %v1739_v54 }
0x15eb   :  { %v1084_v56 = vpop.permute.xlu1 %1083  ;;  %v978_v57 = vpop.permute.xlu0 %977  ;;  %v1740_v60 = vld [vmem:[#allocation3 + $0x18] sm:$0xff]  }
0x15ec   :  { %1090 = vst.msk [vmem:[#allocation3 + $0x30] sm:$0xf] %vm441_vm7, %v1084_v56  ;;  %983 = vst.msk [vmem:[#allocation3 + $0x2c] sm:$0xf] %vm441_vm7, %v978_v57  ;;  %1696 = vmatmul.mubr.msk.bf16.gmra.mxu0 %vm332_vm3, %v1740_v60 }
0x15ef   :  { %v1086_v61 = vpop.permute.xlu0 %1085  ;;  %v1741_v55 = vld [vmem:[#allocation3 + $0x20] sm:$0xff]  }
0x15f0   :  { %1091 = vst.msk [vmem:[#allocation3 + $0x34] sm:$0xf] %vm441_vm7, %v1086_v61  ;;  %1699 = vmatprep.mubr.msk.bf16.mxu0 %vm332_vm3, %v1741_v55 }
0x15f3   :  { %v1742_v59 = vld [vmem:[#allocation3 + $0x28] sm:$0xff]  }
0x15f4   :  { %1700 = vmatmul.mubr.msk.bf16.gmra.mxu0 %vm332_vm3, %v1742_v59 }
0x15f7   :  { %v1743_v0 = vld [vmem:[#allocation3 + $0x30] sm:$0xff]  }
0x15f8   :  { %1703 = vmatprep.mubr.msk.bf16.mxu0 %vm332_vm3, %v1743_v0 }
0x1646   :  { %v1192_v1 = vpop.permute.xlu1 %1191 }
0x1647   :  { %1198 = vst.msk [vmem:[#allocation3 + $0x38] sm:$0xf] %vm441_vm7, %v1192_v1 }
0x164a   :  { %v1203_v30 = vpop.permute.xlu1 %1202  ;;  %v1194_v2 = vpop.permute.xlu0 %1193 }
0x164b   :  { %1208 = vst.msk [vmem:[#allocation16] sm:$0xff] %vm332_vm3, %v1203_v30 }
0x164c   :  { %1199 = vst.msk [vmem:[#allocation3 + $0x3c] sm:$0xf] %vm441_vm7, %v1194_v2 }
0x164e   :  { %v1213_v3 = vpop.permute.xlu1 %1212  ;;  %v1205_v5 = vpop.permute.xlu0 %1204 }
0x164f   :  { %1218 = vst.msk [vmem:[#allocation18] sm:$0xff] %vm332_vm3, %v1213_v3  ;;  %1209 = vst.msk [vmem:[#allocation16 + $0x8] sm:$0xff] %vm332_vm3, %v1205_v5 }
0x1652   :  { %v1215_v36 = vpop.permute.xlu0 %1214 }
0x1653   :  { %v1744_v8 = vld [vmem:[#allocation3 + $0x38] sm:$0xff]   ;;  %1219 = vst.msk [vmem:[#allocation18 + $0x8] sm:$0xff] %vm332_vm3, %v1215_v36 }
0x1654   :  { %1704 = vmatmul.mubr.msk.bf16.gmra.mxu0 %vm332_vm3, %v1744_v8 }
0x1655   :  { %1940 = shalt.err (!%p1937_p6)
}
0x1656   :  { %1459 = dma.vmem_to_hbm [thread:$0]  %s1454_s27, 256, %s2500_s9, [#allocation17], %s2003_s18, %s2003_s18, %s2004_s19  }
0x1657   :  { %s2017_s30 = smov [#allocation18]  }
0x1658   :  { %s1465_s11 = sshll.u32 %s2017_s30, 4  ;;  %s1466_s11 = int_to_ptr.vmem [resolvable:$true] %s1465_s11 }
0x1659   :  { %s1949_s12 = scalar_lea.vmem %s1466_s11, 256  ;;  %p1954_p8 = scmp.lt.s32.totalorder %s1466_s11, %s1466_s11 }
0x165a   :  { %p1950_p7 = scmp.ne.s32.totalorder %s1466_s11, %s1949_s12  ;;  %p1955_p9 = scmp.lt.s32.totalorder %s1949_s12, %s1949_s12 }
0x165c   :  { %p1956_p10 = por %p1955_p9, %p1954_p8 }
0x165e   :  { %p1957_p11 = pnand %p1956_p10, %p1950_p7 }
0x1660   :  { %1960 = shalt.err (!%p1957_p11)
}
0x1661   :  { %1471 = dma.vmem_to_hbm [thread:$0]  %s1466_s11, 256, %s2501_s10, [#allocation17], %s2003_s18, %s2003_s18, %s2004_s19  }
0x1662   :  { %v1524_v9 = vld [vmem:[%s2498_s7] ss:$0 sm:$0xff]  ;;  %s2018_s7 = smov [#allocation15]  }
0x1663   :  { %s1441_s9 = sshll.u32 %s2018_s7, 4  ;;  %s1442_s9 = int_to_ptr.vmem [resolvable:$true] %s1441_s9 }
0x1664   :  { %s1969_s10 = scalar_lea.vmem %s1442_s9, 2048  ;;  %p1974_p13 = scmp.lt.s32.totalorder %s1442_s9, %s1442_s9 }
0x1665   :  { %p1970_p12 = scmp.ne.s32.totalorder %s1442_s9, %s1969_s10  ;;  %p1975_p0 = scmp.lt.s32.totalorder %s1969_s10, %s1969_s10 }
0x1667   :  { %p1976_p1 = por %p1975_p0, %p1974_p13 }
0x1669   :  { %p1977_p2 = pnand %p1976_p1, %p1970_p12 }
0x16a4   :  { %v1693_v40 = vpop.f32.mrf.mxu0 }
0x16a5   :  { %v1366_v42 = vadd.f32 %v1693_v40, %v1524_v9 }
0x16a6   :  { %v1357_v11 = vpop.f32.mrf.mxu0 }
0x16a7   :  { %1422 = vst [vmem:[#allocation15 + $0x10] sm:$0xff] %v1366_v42  ;;  %v1358_v13 = vadd.f32 %v1524_v9, %v1357_v11 }
0x16a8   :  { %v1694_v14 = vpop.f32.mrf.mxu0 }
0x16a9   :  { %1420 = vst [vmem:[#allocation15] sm:$0xff] %v1358_v13  ;;  %v1369_v15 = vadd.f32 %v1694_v14, %v1524_v9 }
0x16aa   :  { %v1360_v20 = vpop.f32.mrf.mxu0 }
0x16ab   :  { %1423 = vst [vmem:[#allocation15 + $0x18] sm:$0xff] %v1369_v15  ;;  %v1361_v10 = vadd.f32 %v1524_v9, %v1360_v20 }
0x16ac   :  { %v1697_v21 = vpop.f32.mrf.mxu0 }
0x16ad   :  { %1421 = vst [vmem:[#allocation15 + $0x8] sm:$0xff] %v1361_v10  ;;  %v1382_v47 = vadd.f32 %v1697_v21, %v1524_v9 }
0x16ae   :  { %v1373_v12 = vpop.f32.mrf.mxu0 }
0x16af   :  { %1426 = vst [vmem:[#allocation15 + $0x30] sm:$0xff] %v1382_v47  ;;  %v1374_v58 = vadd.f32 %v1524_v9, %v1373_v12 }
0x16b0   :  { %v1698_v22 = vpop.f32.mrf.mxu0 }
0x16b1   :  { %1424 = vst [vmem:[#allocation15 + $0x20] sm:$0xff] %v1374_v58  ;;  %v1385_v23 = vadd.f32 %v1698_v22, %v1524_v9 }
0x16b2   :  { %v1376_v27 = vpop.f32.mrf.mxu0 }
0x16b3   :  { %1427 = vst [vmem:[#allocation15 + $0x38] sm:$0xff] %v1385_v23  ;;  %v1377_v38 = vadd.f32 %v1524_v9, %v1376_v27 }
0x16b4   :  { %v1701_v28 = vpop.f32.mrf.mxu0 }
0x16b5   :  { %1425 = vst [vmem:[#allocation15 + $0x28] sm:$0xff] %v1377_v38  ;;  %v1398_v31 = vadd.f32 %v1701_v28, %v1524_v9 }
0x16b6   :  { %v1389_v16 = vpop.f32.mrf.mxu0 }
0x16b7   :  { %1430 = vst [vmem:[#allocation15 + $0x50] sm:$0xff] %v1398_v31  ;;  %v1390_v43 = vadd.f32 %v1524_v9, %v1389_v16 }
0x16b8   :  { %v1702_v18 = vpop.f32.mrf.mxu0 }
0x16b9   :  { %1428 = vst [vmem:[#allocation15 + $0x40] sm:$0xff] %v1390_v43  ;;  %v1401_v6 = vadd.f32 %v1702_v18, %v1524_v9 }
0x16ba   :  { %v1392_v7 = vpop.f32.mrf.mxu0 }
0x16bb   :  { %1431 = vst [vmem:[#allocation15 + $0x58] sm:$0xff] %v1401_v6  ;;  %v1393_v62 = vadd.f32 %v1524_v9, %v1392_v7 }
0x16bd   :  { %1429 = vst [vmem:[#allocation15 + $0x48] sm:$0xff] %v1393_v62 }
0x1714   :  { %v1705_v63 = vpop.f32.mrf.mxu0 }
0x1715   :  { %v1414_v48 = vadd.f32 %v1705_v63, %v1524_v9 }
0x1716   :  { %v1405_v39 = vpop.f32.mrf.mxu0 }
0x1717   :  { %1434 = vst [vmem:[#allocation15 + $0x70] sm:$0xff] %v1414_v48  ;;  %v1406_v25 = vadd.f32 %v1524_v9, %v1405_v39 }
0x1718   :  { %v1706_v26 = vpop.f32.mrf.mxu0 }
0x1719   :  { %1432 = vst [vmem:[#allocation15 + $0x60] sm:$0xff] %v1406_v25  ;;  %v1417_v34 = vadd.f32 %v1706_v26, %v1524_v9 }
0x171a   :  { %v1408_v35 = vpop.f32.mrf.mxu0 }
0x171b   :  { %1435 = vst [vmem:[#allocation15 + $0x78] sm:$0xff] %v1417_v34  ;;  %v1409_v37 = vadd.f32 %v1524_v9, %v1408_v35 }
0x171d   :  { %1433 = vst [vmem:[#allocation15 + $0x68] sm:$0xff] %v1409_v37 }
0x171e   :  { %1980 = shalt.err (!%p1977_p2)
}
0x171f   :  { %1447 = dma.vmem_to_hbm [thread:$0]  %s1442_s9, 2048, %s2499_s8, [#allocation6], %s2003_s18, %s2003_s18, %s2004_s19  }
0x1720   :  { %1997 = dma.done.wait [#allocation6], 2048  }
0x1721   :  { %1998 = vsyncadd [#allocation6], 4294965248 }
0x1722   :  { %1999 = dma.done.wait [#allocation17], 512  }
0x1723   :  { %2000 = vsyncadd [#allocation17], 4294966784 }
0x1724   :  { %1481 = vsyncpa [#allocation5], 1 }
0x1725   :  { %1482 = vsyncpa [#allocation8], 1 }
0x1726   :  { %1483 = vsyncpa [#allocation11], 1 }
0x1727   :  { %1484 = vsyncpa [#allocation14], 1 }
0x1728   :  { %1485 = vsyncpa [#allocation6], 1 }
0x1729   :  { %1486 = vsyncpa [#allocation17], 1 }

</bundles_post_ra>
